<compile_context>
chip_gen: v5e
topology: v5e:2x2
jax: 0.10.0
libtpu: 0.0.40
codegen_flags: <defaults>
</compile_context>

<pallas_src>
import jax
import jax.numpy as jnp
from jax.experimental import pallas as pl
from jax.experimental.pallas import tpu as pltpu


PATCH = 32      # ViT-B/32 patch size
WIDTH = 128     # stand-in vision width (real ViT-B/32 uses 768)
HIDDEN = 64     # assumed SimpleAE hidden width


# ---------------------------------------------------------------------------
# The fused kernel.
#   grid = (latent // tO,)   -- O-tile axis of the bilinear ("arbitrary": the
#                               decoder's first matmul reduces over it)
#   step 0   : vision embed + projection and portion encoder -> VMEM scratch
#   each step: bilinear slab (tO outputs) + decoder-layer-1 accumulation
#   last step: decoder ReLU + layer 2 -> HBM output
# ---------------------------------------------------------------------------
def _fused_kernel(pooled_ref, portion_ref,
                  wpe_ref, bpe_ref, wproj_ref, bproj_ref,
                  enc_w1_ref, enc_b1_ref, enc_w2_ref, enc_b2_ref,
                  bilin_w_ref,                       # (tO, I1, I2) bf16 slab
                  dec_w1_ref, dec_b1_ref,            # (tO, HIDDEN) bf16 slab, (1, HIDDEN) f32
                  dec_w2_ref, dec_b2_ref,            # (HIDDEN, touch) bf16, (1, touch) f32
                  out_ref,
                  vis_scr, por_scr, acc_scr):
    f32 = jnp.float32
    bf16 = jnp.bfloat16
    o = pl.program_id(0)

    @pl.when(o == 0)
    def _():
        # --- image encoder stand-in: (pre-pooled patch) embed + projection.
        #     `pe` never leaves VMEM.
        pe = jnp.dot(pooled_ref[...], wpe_ref[...],
                     preferred_element_type=f32) + bpe_ref[...]
        vis_scr[...] = jnp.dot(pe.astype(bf16), wproj_ref[...],
                               preferred_element_type=f32) + bproj_ref[...]
        # --- portion encoder (SimpleAE.encoder assumed Linear-ReLU-Linear).
        h = jnp.dot(portion_ref[...], enc_w1_ref[...], preferred_element_type=f32)
        h = jnp.maximum(h + enc_b1_ref[...], 0.0)
        por_scr[...] = jnp.dot(h.astype(bf16), enc_w2_ref[...],
                               preferred_element_type=f32) + enc_b2_ref[...]
        acc_scr[...] = jnp.zeros_like(acc_scr)

    # --- nn.Bilinear, one O slab, native (tO, I1, I2) weight layout:
    #       t[o,b,j] = sum_i vis[b,i] * W[o,i,j]     (batched MXU einsum)
    #       lat[o,b] = sum_j t[o,b,j] * por[b,j]     (VPU mul + lane reduce)
    tO = bilin_w_ref.shape[0]
    B, I1 = vis_scr.shape
    vis_b = jnp.broadcast_to(vis_scr[...].astype(bf16)[None], (tO, B, I1))
    t = jnp.einsum('obi,oij->obj', vis_b, bilin_w_ref[...],
                   preferred_element_type=f32)                       # (tO, B, I2)
    lat_ob = jnp.sum(t * por_scr[...][None, :, :], axis=-1)          # (tO, B)
    lat_bo = lat_ob.T                                                # (B, tO)

    # --- touch decoder, layer 1 accumulates across O slabs.
    #     (the bilinear bias is folded into dec_b1_eff in the wrapper)
    acc_scr[...] += jnp.dot(lat_bo.astype(bf16), dec_w1_ref[...],
                            preferred_element_type=f32)

    @pl.when(o == pl.num_programs(0) - 1)
    def _():
        h2 = jnp.maximum(acc_scr[...] + dec_b1_ref[...], 0.0)
        out_ref[...] = jnp.dot(h2.astype(bf16), dec_w2_ref[...],
                               preferred_element_type=f32) + dec_b2_ref[...]


def fused_forward(pooled_bf16, portion_bf16, p, *, t_o=32):
    """pooled: (B, K) bf16 mean-pooled patch rows; portion: (B, P) bf16."""
    B, K = pooled_bf16.shape
    port_dim = portion_bf16.shape[1]
    latent = p["bilin_w_bf16"].shape[0]
    touch_dim = p["dec_b22"].shape[-1]
    t_o = min(t_o, latent)
    assert latent % t_o == 0, (latent, t_o)

    const2 = lambda o: (0, 0)
    args_specs = [
        (pooled_bf16,        pl.BlockSpec((B, K), const2)),
        (portion_bf16,       pl.BlockSpec((B, port_dim), const2)),
        (p["w_pe_bf16"],     pl.BlockSpec((K, WIDTH), const2)),
        (p["b_pe2"],         pl.BlockSpec((1, WIDTH), const2)),
        (p["w_proj_bf16"],   pl.BlockSpec((WIDTH, latent), const2)),
        (p["b_proj2"],       pl.BlockSpec((1, latent), const2)),
        (p["enc_w1_bf16"],   pl.BlockSpec((port_dim, HIDDEN), const2)),
        (p["enc_b12"],       pl.BlockSpec((1, HIDDEN), const2)),
        (p["enc_w2_bf16"],   pl.BlockSpec((HIDDEN, latent), const2)),
        (p["enc_b22"],       pl.BlockSpec((1, latent), const2)),
        # streamed per O tile:
        (p["bilin_w_bf16"],  pl.BlockSpec((t_o, latent, latent), lambda o: (o, 0, 0))),
        (p["dec_w1_bf16"],   pl.BlockSpec((t_o, HIDDEN), lambda o: (o, 0))),
        # constant tail:
        (p["dec_b1_eff2"],   pl.BlockSpec((1, HIDDEN), const2)),
        (p["dec_w2_bf16"],   pl.BlockSpec((HIDDEN, touch_dim), const2)),
        (p["dec_b22"],       pl.BlockSpec((1, touch_dim), const2)),
    ]
    args = [a for a, _ in args_specs]
    in_specs = [s for _, s in args_specs]

    return pl.pallas_call(
        _fused_kernel,
        out_shape=jax.ShapeDtypeStruct((B, touch_dim), jnp.float32),
        grid_spec=pltpu.PrefetchScalarGridSpec(
            num_scalar_prefetch=0,
            grid=(latent // t_o,),
            in_specs=in_specs,
            out_specs=pl.BlockSpec((B, touch_dim), const2),
            scratch_shapes=[
                pltpu.VMEM((B, latent), jnp.float32),   # vis  (image latent)
                pltpu.VMEM((B, latent), jnp.float32),   # por  (portion latent)
                pltpu.VMEM((B, HIDDEN), jnp.float32),   # decoder layer-1 accumulator
            ]),
        compiler_params=pltpu.CompilerParams(
            dimension_semantics=("arbitrary",)),
    )(*args)


# ---------------------------------------------------------------------------
# Parameters + forward
# ---------------------------------------------------------------------------
def init_params(key, latent_dim, portion_dim, touch_dim):
    ks = jax.random.split(key, 12)
    s = 0.1
    p = {
        # image encoder stand-in
        "w_pe":   s * jax.random.normal(ks[0], (3 * PATCH * PATCH, WIDTH), jnp.float32),
        "b_pe":   s * jax.random.normal(ks[1], (WIDTH,), jnp.float32),
        "w_proj": s * jax.random.normal(ks[2], (WIDTH, latent_dim), jnp.float32),
        "b_proj": s * jax.random.normal(ks[3], (latent_dim,), jnp.float32),
        # portion encoder
        "enc_w1": s * jax.random.normal(ks[4], (portion_dim, HIDDEN), jnp.float32),
        "enc_b1": s * jax.random.normal(ks[5], (HIDDEN,), jnp.float32),
        "enc_w2": s * jax.random.normal(ks[6], (HIDDEN, latent_dim), jnp.float32),
        "enc_b2": s * jax.random.normal(ks[7], (latent_dim,), jnp.float32),
        # nn.Bilinear(latent, latent, latent): weight (O, I1, I2), bias (O,)
        "bilin_w": s * jax.random.normal(ks[8], (latent_dim, latent_dim, latent_dim), jnp.float32),
        "bilin_b": s * jax.random.normal(ks[9], (latent_dim,), jnp.float32),
        # touch decoder
        "dec_w1": s * jax.random.normal(ks[10], (latent_dim, HIDDEN), jnp.float32),
        "dec_b1": jnp.zeros((HIDDEN,), jnp.float32),
        "dec_w2": s * jax.random.normal(ks[11], (HIDDEN, touch_dim), jnp.float32),
        "dec_b2": jnp.zeros((touch_dim,), jnp.float32),
    }
    # --- derived kernel-side layouts ---
    # bf16 copies of every weight (f32 MXU accumulation in-kernel).
    for name in ("w_pe", "w_proj", "enc_w1", "enc_w2", "bilin_w", "dec_w1", "dec_w2"):
        p[name + "_bf16"] = p[name].astype(jnp.bfloat16)
    # (1, N) f32 biases for lane-broadcast adds in-kernel.
    for name in ("b_pe", "b_proj", "enc_b1", "enc_b2", "dec_b2"):
        p[name + "2"] = p[name].reshape(1, -1)
    # The bilinear bias feeds a Linear before the next nonlinearity, so fold it
    # (exactly, in f32) into the decoder's first bias:
    #   relu((bilin + b_bil) @ W1 + b1) == relu(bilin @ W1 + (b1 + b_bil @ W1)).
    p["dec_b1_eff2"] = (p["dec_b1"] + p["bilin_b"] @ p["dec_w1"]).reshape(1, -1)
    return p


def extract_patches(vision):
    """NCHW image -> (B, num_patches, C*p*p), PyTorch conv weight order."""
    B, C, H, W = vision.shape
    pp = PATCH
    x = vision.reshape(B, C, H // pp, pp, W // pp, pp)
    x = x.transpose(0, 2, 4, 1, 3, 5)                      # (B, Hp, Wp, C, p, p)
    return x.reshape(B, (H // pp) * (W // pp), C * pp * pp)


def constantinople_clip_forward(vision, portion, params):
    B, C, H, W = vision.shape
    pp = PATCH
    # Mean-pool over patch positions BEFORE the (linear) patch embed: the
    # stand-in embed is linear, so mean(patches) @ W == mean(patches @ W).
    # This is pure layout plumbing (tiny XLA reduce) and shrinks the kernel's
    # vision matmul from (B*Np, K) rows to (B, K) rows.
    pooled = vision.reshape(B, C, H // pp, pp, W // pp, pp).mean(axis=(2, 4))
    pooled = pooled.reshape(B, C * pp * pp).astype(jnp.bfloat16)       # (B, K)
    # Everything else runs in ONE fused pallas_call.
    return fused_forward(pooled, portion.astype(jnp.bfloat16), params)


# ---------------------------------------------------------------------------
# Pure-JAX reference (same math, f32 end-to-end, patch-embed-then-mean order)
# ---------------------------------------------------------------------------
def reference_forward(vision, portion, params):
    patches = extract_patches(vision).astype(jnp.float32)    # (B, Np, K)
    pe = patches @ params["w_pe"] + params["b_pe"]           # (B, Np, WIDTH)
    vis = pe.mean(axis=1) @ params["w_proj"] + params["b_proj"]
    h = jnp.maximum(portion @ params["enc_w1"] + params["enc_b1"], 0.0)
    por = h @ params["enc_w2"] + params["enc_b2"]
    latent = jnp.einsum("ni,oij,nj->no", vis, params["bilin_w"], por) + params["bilin_b"]
    h2 = jnp.maximum(latent @ params["dec_w1"] + params["dec_b1"], 0.0)
    return h2 @ params["dec_w2"] + params["dec_b2"]


if __name__ == "__main__":
    LATENT_DIM = 64     # small-shape stand-in (module default is 512)
    PORTION_DIM = 12
    TOUCH_DIM = 4

    key = jax.random.PRNGKey(0)
    k_p, k_v, k_q = jax.random.split(key, 3)

    params = init_params(k_p, LATENT_DIM, PORTION_DIM, TOUCH_DIM)
    vision = jax.random.normal(k_v, (2, 3, 128, 128), jnp.float32)   # NCHW -> 16 patches/img
    portion = jax.random.normal(k_q, (2, PORTION_DIM), jnp.float32)

    fwd = jax.jit(constantinople_clip_forward)
    out = jax.block_until_ready(fwd(vision, portion, params))

    ref = reference_forward(vision, portion, params)
    assert out.shape == (2, TOUCH_DIM), out.shape
    assert bool(jnp.all(jnp.isfinite(out)))
    assert bool(jnp.allclose(out, ref, rtol=1e-1, atol=2e-2)), (out, ref)

    print("KERNEL_OK")
</pallas_src>

<mosaic_0001>
module attributes {stable_mosaic.version = 11 : i64} {
  func.func @_fused_kernel(%arg0: i32, %arg1: memref<2x3072xbf16, #tpu.memory_space<vmem>>, %arg2: memref<2x12xbf16, #tpu.memory_space<vmem>>, %arg3: memref<3072x128xbf16, #tpu.memory_space<vmem>>, %arg4: memref<1x128xf32, #tpu.memory_space<vmem>>, %arg5: memref<128x64xbf16, #tpu.memory_space<vmem>>, %arg6: memref<1x64xf32, #tpu.memory_space<vmem>>, %arg7: memref<12x64xbf16, #tpu.memory_space<vmem>>, %arg8: memref<1x64xf32, #tpu.memory_space<vmem>>, %arg9: memref<64x64xbf16, #tpu.memory_space<vmem>>, %arg10: memref<1x64xf32, #tpu.memory_space<vmem>>, %arg11: memref<32x64x64xbf16, #tpu.memory_space<vmem>>, %arg12: memref<32x64xbf16, #tpu.memory_space<vmem>>, %arg13: memref<1x64xf32, #tpu.memory_space<vmem>>, %arg14: memref<64x4xbf16, #tpu.memory_space<vmem>>, %arg15: memref<1x4xf32, #tpu.memory_space<vmem>>, %arg16: memref<2x4xf32, #tpu.memory_space<vmem>>, %arg17: memref<2x64xf32, #tpu.memory_space<vmem>>, %arg18: memref<2x64xf32, #tpu.memory_space<vmem>>, %arg19: memref<2x64xf32, #tpu.memory_space<vmem>>) attributes {dimension_semantics = [#tpu.dimension_semantics<arbitrary>], iteration_bounds = array<i64: 2>, scalar_prefetch = 0 : i64, scratch_operands = 3 : i64, tpu.core_type = #tpu.core_type<tc>, window_params = [{pipeline_mode = #tpu.pipeline_mode<synchronous>, transform_indices = @transform_0, window_bounds = array<i64: 2, 3072>}, {pipeline_mode = #tpu.pipeline_mode<synchronous>, transform_indices = @transform_1, window_bounds = array<i64: 2, 12>}, {pipeline_mode = #tpu.pipeline_mode<synchronous>, transform_indices = @transform_2, window_bounds = array<i64: 3072, 128>}, {pipeline_mode = #tpu.pipeline_mode<synchronous>, transform_indices = @transform_3, window_bounds = array<i64: 1, 128>}, {pipeline_mode = #tpu.pipeline_mode<synchronous>, transform_indices = @transform_4, window_bounds = array<i64: 128, 64>}, {pipeline_mode = #tpu.pipeline_mode<synchronous>, transform_indices = @transform_5, window_bounds = array<i64: 1, 64>}, {pipeline_mode = #tpu.pipeline_mode<synchronous>, transform_indices = @transform_6, window_bounds = array<i64: 12, 64>}, {pipeline_mode = #tpu.pipeline_mode<synchronous>, transform_indices = @transform_7, window_bounds = array<i64: 1, 64>}, {pipeline_mode = #tpu.pipeline_mode<synchronous>, transform_indices = @transform_8, window_bounds = array<i64: 64, 64>}, {pipeline_mode = #tpu.pipeline_mode<synchronous>, transform_indices = @transform_9, window_bounds = array<i64: 1, 64>}, {transform_indices = @transform_10, window_bounds = array<i64: 32, 64, 64>}, {transform_indices = @transform_11, window_bounds = array<i64: 32, 64>}, {pipeline_mode = #tpu.pipeline_mode<synchronous>, transform_indices = @transform_12, window_bounds = array<i64: 1, 64>}, {pipeline_mode = #tpu.pipeline_mode<synchronous>, transform_indices = @transform_13, window_bounds = array<i64: 64, 4>}, {pipeline_mode = #tpu.pipeline_mode<synchronous>, transform_indices = @transform_14, window_bounds = array<i64: 1, 4>}, {pipeline_mode = #tpu.pipeline_mode<synchronous>, transform_indices = @transform_15, window_bounds = array<i64: 2, 4>}]} {
    %c0_i32 = arith.constant 0 : i32
    %0 = arith.cmpi eq, %arg0, %c0_i32 : i32
    %1 = arith.extui %0 : i1 to i32
    %c0_i32_0 = arith.constant 0 : i32
    %2 = arith.cmpi ne, %1, %c0_i32_0 : i32
    scf.if %2 {
      %c0_16 = arith.constant 0 : index
      %c0_17 = arith.constant 0 : index
      %25 = vector.load %arg1[%c0_16, %c0_17] : memref<2x3072xbf16, #tpu.memory_space<vmem>>, vector<2x3072xbf16>
      %c0_18 = arith.constant 0 : index
      %c0_19 = arith.constant 0 : index
      %26 = vector.load %arg3[%c0_18, %c0_19] : memref<3072x128xbf16, #tpu.memory_space<vmem>>, vector<3072x128xbf16>
      %cst_20 = arith.constant dense<0.000000e+00> : vector<2x128xf32>
      %27 = tpu.matmul %25, %26, %cst_20 {dimension_numbers = #tpu.dot_dimension_numbers<[1], [0], [0], [1], [0, 0, 1, 1], [], []>} : vector<2x3072xbf16>, vector<3072x128xbf16>, vector<2x128xf32> -> vector<2x128xf32>
      %c0_21 = arith.constant 0 : index
      %c0_22 = arith.constant 0 : index
      %28 = vector.load %arg4[%c0_21, %c0_22] : memref<1x128xf32, #tpu.memory_space<vmem>>, vector<1x128xf32>
      %29 = vector.broadcast %28 : vector<1x128xf32> to vector<2x128xf32>
      %30 = arith.addf %27, %29 : vector<2x128xf32>
      %31 = arith.truncf %30 : vector<2x128xf32> to vector<2x128xbf16>
      %c0_23 = arith.constant 0 : index
      %c0_24 = arith.constant 0 : index
      %32 = vector.load %arg5[%c0_23, %c0_24] : memref<128x64xbf16, #tpu.memory_space<vmem>>, vector<128x64xbf16>
      %cst_25 = arith.constant dense<0.000000e+00> : vector<2x64xf32>
      %33 = tpu.matmul %31, %32, %cst_25 {dimension_numbers = #tpu.dot_dimension_numbers<[1], [0], [0], [1], [0, 0, 1, 1], [], []>} : vector<2x128xbf16>, vector<128x64xbf16>, vector<2x64xf32> -> vector<2x64xf32>
      %c0_26 = arith.constant 0 : index
      %c0_27 = arith.constant 0 : index
      %34 = vector.load %arg6[%c0_26, %c0_27] : memref<1x64xf32, #tpu.memory_space<vmem>>, vector<1x64xf32>
      %35 = vector.broadcast %34 : vector<1x64xf32> to vector<2x64xf32>
      %36 = arith.addf %33, %35 : vector<2x64xf32>
      %c0_28 = arith.constant 0 : index
      %c0_29 = arith.constant 0 : index
      %37 = vector.load %arg17[%c0_28, %c0_29] : memref<2x64xf32, #tpu.memory_space<vmem>>, vector<2x64xf32>
      tpu.vector_store %arg17[%c0_28, %c0_29], %36 {strides = array<i32>} : memref<2x64xf32, #tpu.memory_space<vmem>>, vector<2x64xf32>,
      %c0_30 = arith.constant 0 : index
      %c0_31 = arith.constant 0 : index
      %38 = vector.load %arg2[%c0_30, %c0_31] : memref<2x12xbf16, #tpu.memory_space<vmem>>, vector<2x12xbf16>
      %c0_32 = arith.constant 0 : index
      %c0_33 = arith.constant 0 : index
      %39 = vector.load %arg7[%c0_32, %c0_33] : memref<12x64xbf16, #tpu.memory_space<vmem>>, vector<12x64xbf16>
      %cst_34 = arith.constant dense<0.000000e+00> : vector<2x64xf32>
      %40 = tpu.matmul %38, %39, %cst_34 {dimension_numbers = #tpu.dot_dimension_numbers<[1], [0], [0], [1], [0, 0, 1, 1], [], []>} : vector<2x12xbf16>, vector<12x64xbf16>, vector<2x64xf32> -> vector<2x64xf32>
      %c0_35 = arith.constant 0 : index
      %c0_36 = arith.constant 0 : index
      %41 = vector.load %arg8[%c0_35, %c0_36] : memref<1x64xf32, #tpu.memory_space<vmem>>, vector<1x64xf32>
      %42 = vector.broadcast %41 : vector<1x64xf32> to vector<2x64xf32>
      %43 = arith.addf %40, %42 : vector<2x64xf32>
      %cst_37 = arith.constant 0.000000e+00 : f32
      %44 = vector.broadcast %cst_37 : f32 to vector<2x64xf32>
      %45 = arith.maximumf %43, %44 : vector<2x64xf32>
      %46 = arith.truncf %45 : vector<2x64xf32> to vector<2x64xbf16>
      %c0_38 = arith.constant 0 : index
      %c0_39 = arith.constant 0 : index
      %47 = vector.load %arg9[%c0_38, %c0_39] : memref<64x64xbf16, #tpu.memory_space<vmem>>, vector<64x64xbf16>
      %cst_40 = arith.constant dense<0.000000e+00> : vector<2x64xf32>
      %48 = tpu.matmul %46, %47, %cst_40 {dimension_numbers = #tpu.dot_dimension_numbers<[1], [0], [0], [1], [0, 0, 1, 1], [], []>} : vector<2x64xbf16>, vector<64x64xbf16>, vector<2x64xf32> -> vector<2x64xf32>
      %c0_41 = arith.constant 0 : index
      %c0_42 = arith.constant 0 : index
      %49 = vector.load %arg10[%c0_41, %c0_42] : memref<1x64xf32, #tpu.memory_space<vmem>>, vector<1x64xf32>
      %50 = vector.broadcast %49 : vector<1x64xf32> to vector<2x64xf32>
      %51 = arith.addf %48, %50 : vector<2x64xf32>
      %c0_43 = arith.constant 0 : index
      %c0_44 = arith.constant 0 : index
      %52 = vector.load %arg18[%c0_43, %c0_44] : memref<2x64xf32, #tpu.memory_space<vmem>>, vector<2x64xf32>
      tpu.vector_store %arg18[%c0_43, %c0_44], %51 {strides = array<i32>} : memref<2x64xf32, #tpu.memory_space<vmem>>, vector<2x64xf32>,
      %cst_45 = arith.constant 0.000000e+00 : f32
      %53 = vector.broadcast %cst_45 : f32 to vector<2x64xf32>
      %c0_46 = arith.constant 0 : index
      %c0_47 = arith.constant 0 : index
      %54 = vector.load %arg19[%c0_46, %c0_47] : memref<2x64xf32, #tpu.memory_space<vmem>>, vector<2x64xf32>
      tpu.vector_store %arg19[%c0_46, %c0_47], %53 {strides = array<i32>} : memref<2x64xf32, #tpu.memory_space<vmem>>, vector<2x64xf32>,
    } else {
    }
    %c0 = arith.constant 0 : index
    %c0_1 = arith.constant 0 : index
    %3 = vector.load %arg17[%c0, %c0_1] : memref<2x64xf32, #tpu.memory_space<vmem>>, vector<2x64xf32>
    %4 = arith.truncf %3 : vector<2x64xf32> to vector<2x64xbf16>
    %5 = vector.shape_cast %4 : vector<2x64xbf16> to vector<1x2x64xbf16>
    %6 = vector.shape_cast %5 : vector<1x2x64xbf16> to vector<1x2x64xbf16>
    %7 = vector.broadcast %6 : vector<1x2x64xbf16> to vector<32x2x64xbf16>
    %c0_2 = arith.constant 0 : index
    %c0_3 = arith.constant 0 : index
    %c0_4 = arith.constant 0 : index
    %8 = vector.load %arg11[%c0_2, %c0_3, %c0_4] : memref<32x64x64xbf16, #tpu.memory_space<vmem>>, vector<32x64x64xbf16>
    "tpu.trace_start"() <{level = 10 : i32, message = "obi,oij->obj"}> : () -> ()
    %cst = arith.constant dense<0.000000e+00> : vector<32x2x64xf32>
    %9 = tpu.matmul %7, %8, %cst {dimension_numbers = #tpu.dot_dimension_numbers<[2], [1], [1], [2], [0, 0, 0, 1, 1, 2], [0], [0]>} : vector<32x2x64xbf16>, vector<32x64x64xbf16>, vector<32x2x64xf32> -> vector<32x2x64xf32>
    "tpu.trace_stop"() : () -> ()
    %c0_5 = arith.constant 0 : index
    %c0_6 = arith.constant 0 : index
    %10 = vector.load %arg18[%c0_5, %c0_6] : memref<2x64xf32, #tpu.memory_space<vmem>>, vector<2x64xf32>
    %11 = vector.shape_cast %10 : vector<2x64xf32> to vector<1x2x64xf32>
    %12 = vector.broadcast %11 : vector<1x2x64xf32> to vector<32x2x64xf32>
    %13 = arith.mulf %9, %12 : vector<32x2x64xf32>
    %cst_7 = arith.constant dense<0.000000e+00> : vector<32x2xf32>
    %14 = vector.multi_reduction <add>, %13, %cst_7 [2] : vector<32x2x64xf32> to vector<32x2xf32>
    %15 = tpu.transpose %14, [1, 0] : vector<32x2xf32> -> vector<2x32xf32>
    %c0_8 = arith.constant 0 : index
    %c0_9 = arith.constant 0 : index
    %16 = vector.load %arg19[%c0_8, %c0_9] : memref<2x64xf32, #tpu.memory_space<vmem>>, vector<2x64xf32>
    %17 = arith.truncf %15 : vector<2x32xf32> to vector<2x32xbf16>
    %c0_10 = arith.constant 0 : index
    %c0_11 = arith.constant 0 : index
    %18 = vector.load %arg12[%c0_10, %c0_11] : memref<32x64xbf16, #tpu.memory_space<vmem>>, vector<32x64xbf16>
    %cst_12 = arith.constant dense<0.000000e+00> : vector<2x64xf32>
    %19 = tpu.matmul %17, %18, %cst_12 {dimension_numbers = #tpu.dot_dimension_numbers<[1], [0], [0], [1], [0, 0, 1, 1], [], []>} : vector<2x32xbf16>, vector<32x64xbf16>, vector<2x64xf32> -> vector<2x64xf32>
    %20 = arith.addf %16, %19 : vector<2x64xf32>
    %c0_13 = arith.constant 0 : index
    %c0_14 = arith.constant 0 : index
    %21 = vector.load %arg19[%c0_13, %c0_14] : memref<2x64xf32, #tpu.memory_space<vmem>>, vector<2x64xf32>
    tpu.vector_store %arg19[%c0_13, %c0_14], %20 {strides = array<i32>} : memref<2x64xf32, #tpu.memory_space<vmem>>, vector<2x64xf32>,
    %c1_i32 = arith.constant 1 : i32
    %22 = arith.cmpi eq, %arg0, %c1_i32 : i32
    %23 = arith.extui %22 : i1 to i32
    %c0_i32_15 = arith.constant 0 : i32
    %24 = arith.cmpi ne, %23, %c0_i32_15 : i32
    scf.if %24 {
      %c0_16 = arith.constant 0 : index
      %c0_17 = arith.constant 0 : index
      %25 = vector.load %arg19[%c0_16, %c0_17] : memref<2x64xf32, #tpu.memory_space<vmem>>, vector<2x64xf32>
      %c0_18 = arith.constant 0 : index
      %c0_19 = arith.constant 0 : index
      %26 = vector.load %arg13[%c0_18, %c0_19] : memref<1x64xf32, #tpu.memory_space<vmem>>, vector<1x64xf32>
      %27 = vector.broadcast %26 : vector<1x64xf32> to vector<2x64xf32>
      %28 = arith.addf %25, %27 : vector<2x64xf32>
      %cst_20 = arith.constant 0.000000e+00 : f32
      %29 = vector.broadcast %cst_20 : f32 to vector<2x64xf32>
      %30 = arith.maximumf %28, %29 : vector<2x64xf32>
      %31 = arith.truncf %30 : vector<2x64xf32> to vector<2x64xbf16>
      %c0_21 = arith.constant 0 : index
      %c0_22 = arith.constant 0 : index
      %32 = vector.load %arg14[%c0_21, %c0_22] : memref<64x4xbf16, #tpu.memory_space<vmem>>, vector<64x4xbf16>
      %cst_23 = arith.constant dense<0.000000e+00> : vector<2x4xf32>
      %33 = tpu.matmul %31, %32, %cst_23 {dimension_numbers = #tpu.dot_dimension_numbers<[1], [0], [0], [1], [0, 0, 1, 1], [], []>} : vector<2x64xbf16>, vector<64x4xbf16>, vector<2x4xf32> -> vector<2x4xf32>
      %c0_24 = arith.constant 0 : index
      %c0_25 = arith.constant 0 : index
      %34 = vector.load %arg15[%c0_24, %c0_25] : memref<1x4xf32, #tpu.memory_space<vmem>>, vector<1x4xf32>
      %35 = vector.broadcast %34 : vector<1x4xf32> to vector<2x4xf32>
      %36 = arith.addf %33, %35 : vector<2x4xf32>
      %c0_26 = arith.constant 0 : index
      %c0_27 = arith.constant 0 : index
      %37 = vector.load %arg16[%c0_26, %c0_27] : memref<2x4xf32, #tpu.memory_space<vmem>>, vector<2x4xf32>
      tpu.vector_store %arg16[%c0_26, %c0_27], %36 {strides = array<i32>} : memref<2x4xf32, #tpu.memory_space<vmem>>, vector<2x4xf32>,
    } else {
    }
    return
  }
  func.func @transform_0(%arg0: i32) -> (i32, i32) {
    %c0_i32 = arith.constant 0 : i32
    %c0_i32_0 = arith.constant 0 : i32
    %c0_i32_1 = arith.constant 0 : i32
    return %c0_i32, %c0_i32_0 : i32, i32
  }
  func.func @transform_1(%arg0: i32) -> (i32, i32) {
    %c0_i32 = arith.constant 0 : i32
    %c0_i32_0 = arith.constant 0 : i32
    %c0_i32_1 = arith.constant 0 : i32
    return %c0_i32, %c0_i32_0 : i32, i32
  }
  func.func @transform_2(%arg0: i32) -> (i32, i32) {
    %c0_i32 = arith.constant 0 : i32
    %c0_i32_0 = arith.constant 0 : i32
    %c0_i32_1 = arith.constant 0 : i32
    return %c0_i32, %c0_i32_0 : i32, i32
  }
  func.func @transform_3(%arg0: i32) -> (i32, i32) {
    %c0_i32 = arith.constant 0 : i32
    %c0_i32_0 = arith.constant 0 : i32
    %c0_i32_1 = arith.constant 0 : i32
    return %c0_i32, %c0_i32_0 : i32, i32
  }
  func.func @transform_4(%arg0: i32) -> (i32, i32) {
    %c0_i32 = arith.constant 0 : i32
    %c0_i32_0 = arith.constant 0 : i32
    %c0_i32_1 = arith.constant 0 : i32
    return %c0_i32, %c0_i32_0 : i32, i32
  }
  func.func @transform_5(%arg0: i32) -> (i32, i32) {
    %c0_i32 = arith.constant 0 : i32
    %c0_i32_0 = arith.constant 0 : i32
    %c0_i32_1 = arith.constant 0 : i32
    return %c0_i32, %c0_i32_0 : i32, i32
  }
  func.func @transform_6(%arg0: i32) -> (i32, i32) {
    %c0_i32 = arith.constant 0 : i32
    %c0_i32_0 = arith.constant 0 : i32
    %c0_i32_1 = arith.constant 0 : i32
    return %c0_i32, %c0_i32_0 : i32, i32
  }
  func.func @transform_7(%arg0: i32) -> (i32, i32) {
    %c0_i32 = arith.constant 0 : i32
    %c0_i32_0 = arith.constant 0 : i32
    %c0_i32_1 = arith.constant 0 : i32
    return %c0_i32, %c0_i32_0 : i32, i32
  }
  func.func @transform_8(%arg0: i32) -> (i32, i32) {
    %c0_i32 = arith.constant 0 : i32
    %c0_i32_0 = arith.constant 0 : i32
    %c0_i32_1 = arith.constant 0 : i32
    return %c0_i32, %c0_i32_0 : i32, i32
  }
  func.func @transform_9(%arg0: i32) -> (i32, i32) {
    %c0_i32 = arith.constant 0 : i32
    %c0_i32_0 = arith.constant 0 : i32
    %c0_i32_1 = arith.constant 0 : i32
    return %c0_i32, %c0_i32_0 : i32, i32
  }
  func.func @transform_10(%arg0: i32) -> (i32, i32, i32) {
    %c0_i32 = arith.constant 0 : i32
    %c0_i32_0 = arith.constant 0 : i32
    %c0_i32_1 = arith.constant 0 : i32
    return %arg0, %c0_i32, %c0_i32_0 : i32, i32, i32
  }
  func.func @transform_11(%arg0: i32) -> (i32, i32) {
    %c0_i32 = arith.constant 0 : i32
    %c0_i32_0 = arith.constant 0 : i32
    return %arg0, %c0_i32 : i32, i32
  }
  func.func @transform_12(%arg0: i32) -> (i32, i32) {
    %c0_i32 = arith.constant 0 : i32
    %c0_i32_0 = arith.constant 0 : i32
    %c0_i32_1 = arith.constant 0 : i32
    return %c0_i32, %c0_i32_0 : i32, i32
  }
  func.func @transform_13(%arg0: i32) -> (i32, i32) {
    %c0_i32 = arith.constant 0 : i32
    %c0_i32_0 = arith.constant 0 : i32
    %c0_i32_1 = arith.constant 0 : i32
    return %c0_i32, %c0_i32_0 : i32, i32
  }
  func.func @transform_14(%arg0: i32) -> (i32, i32) {
    %c0_i32 = arith.constant 0 : i32
    %c0_i32_0 = arith.constant 0 : i32
    %c0_i32_1 = arith.constant 0 : i32
    return %c0_i32, %c0_i32_0 : i32, i32
  }
  func.func @transform_15(%arg0: i32) -> (i32, i32) {
    %c0_i32 = arith.constant 0 : i32
    %c0_i32_0 = arith.constant 0 : i32
    %c0_i32_1 = arith.constant 0 : i32
    return %c0_i32, %c0_i32_0 : i32, i32
  }
}

</mosaic_0001>

<bundles_post_ra>
// kernel: constantinople_clip_forward.1
= control target key start
LH: loop header
LB: loop body
LE: loop exit
PB: predicated region body
PF: predicated region fallthrough
CT: control target
= control target key end

     0   :  { %20 = vsyncpa [#allocation6], 0  ;;  %s6364_s18 = smov 0   ;;  %s7393_s0 = inlined_call_operand.vmem [shape: bf16[2,3072], index: 0, kind: input, shape index: {}]   ;;  %s7394_s1 = inlined_call_operand.vmem [shape: bf16[2,12], index: 1, kind: input, shape index: {}]   ;;  %s7395_s2 = inlined_call_operand.vmem [shape: bf16[3072,128], index: 2, kind: input, shape index: {}]   ;;  %s7396_s3 = inlined_call_operand.vmem [shape: f32[1,128], index: 3, kind: input, shape index: {}]   ;;  %s7397_s4 = inlined_call_operand.vmem [shape: bf16[128,64], index: 4, kind: input, shape index: {}]   ;;  %s7398_s5 = inlined_call_operand.vmem [shape: f32[1,64], index: 5, kind: input, shape index: {}]   ;;  %s7399_s6 = inlined_call_operand.vmem [shape: bf16[12,64], index: 6, kind: input, shape index: {}]   ;;  %s7400_s7 = inlined_call_operand.vmem [shape: f32[1,64], index: 7, kind: input, shape index: {}]   ;;  %s7401_s8 = inlined_call_operand.vmem [shape: bf16[64,64], index: 8, kind: input, shape index: {}]   ;;  %s7402_s9 = inlined_call_operand.vmem [shape: f32[1,64], index: 9, kind: input, shape index: {}]   ;;  %s7403_s10 = inlined_call_operand.vmem [shape: bf16[64,64,64], index: 10, kind: input, shape index: {}]   ;;  %s7404_s11 = inlined_call_operand.vmem [shape: bf16[64,64], index: 11, kind: input, shape index: {}]   ;;  %s7405_s12 = inlined_call_operand.vmem [shape: f32[1,64], index: 12, kind: input, shape index: {}]   ;;  %s7406_s13 = inlined_call_operand.vmem [shape: bf16[64,4], index: 13, kind: input, shape index: {}]   ;;  %s7407_s14 = inlined_call_operand.vmem [shape: f32[1,4], index: 14, kind: input, shape index: {}]   ;;  %s7408_s15 = inlined_call_operand.hbm [shape: f32[2,4], index: 15, kind: output, shape index: {}]  }
   0x1 LB: > { %s6370_s19 = sadd.s32 4294967295, %s6280_s18   ;;  %p4475_p0 = scmp.ge.s32.totalorder %s6280_s18, 1  ;;  %s6280_s18 = sphi %s6364_s18, %s26_s18  }
   0x2   : > { %p446_p1 = scmp.lt.s32.totalorder %s6280_s18, 3 }
   0x4   : > { %p447_p2 = pnand %p4475_p0, %p446_p1 }
   0x5   : > { %s4476_s20 = sshll.u32 (!%p447_p2), %s6370_s19, 5  ;;  %s4479_s21 = sshll.u32 (!%p447_p2), %s6370_s19, 2 }
   0x6   : > { %450 = sbr.rel (%p447_p2) target bundleno = 1306 (0x51a), region = 80  ;;  %p496_p3 = scmp.lt.s32.totalorder (!%p447_p2), %s4476_s20, 63 }
   0x7   : > { %p503_p4 = scmp.lt.s32.totalorder (!%p447_p2), %s4479_s21, 7  ;;  %p4481_p5 = scmp.ne.s32.totalorder (!%p447_p2), %s6370_s19, 0 }
   0xb   : > { %s7410_s20 = smov (!%p496_p3, %s4476_s20), 63  ;;  %s7412_s21 = smov (!%p503_p4, %s4479_s21), 7 }
   0xc   : > { %s5879_s22 = sshll.u32 %s7410_s20, 5  ;;  %s4480_s26 = sshll.u32 %s7412_s21, 2 }
   0xd   : > { %s6379_s25 = scalar_lea.vmem %s7403_s10, %s5879_s22  ;;  %s6384_s29 = scalar_lea.vmem %s7404_s11, %s4480_s26 }
   0xe   : > { %512 = sbr.rel (%p4481_p5) target bundleno = 500 (0x1f4), region = 84 }
  0x13   : > { %v5887_v0 = vld [vmem:[%s7395_s2 + $0x38] sm:$0xff]  ;;  %v5886_v4 = vld [vmem:[%s7395_s2 + $0x30] sm:$0xff]  ;;  %v5885_v8 = vld [vmem:[%s7395_s2 + $0x28] sm:$0xff]  ;;  %vm2522_vm0 = vcmask 1045504   ;;  %vm2518_vm1 = vcmask 97280   ;;  %vm2577_vm2 = vcmask 523264  }
  0x14   : > { %v5895_v1 = vld [vmem:[%s7395_s2 + $0x78] sm:$0xff]  ;;  %2110 = vmatpush.bf16.msra.mxu0 %v5887_v0  ;;  %v5894_v5 = vld [vmem:[%s7395_s2 + $0x70] sm:$0xff]  ;;  %v5893_v9 = vld [vmem:[%s7395_s2 + $0x68] sm:$0xff]  ;;  %vm2504_vm3 = vcmask 517120  }
  0x15   : > { %v5903_v2 = vld [vmem:[%s7395_s2 + $0xb8] sm:$0xff]  ;;  %2123 = vmatpush.bf16.msra.mxu1 %v5895_v1  ;;  %v5902_v6 = vld [vmem:[%s7395_s2 + $0xb0] sm:$0xff]  ;;  %v5901_v10 = vld [vmem:[%s7395_s2 + $0xa8] sm:$0xff] }
  0x16   : > { %v5911_v3 = vld [vmem:[%s7395_s2 + $0xf8] sm:$0xff]  ;;  %2136 = vmatpush.bf16.msra.mxu2 %v5903_v2  ;;  %v5910_v7 = vld [vmem:[%s7395_s2 + $0xf0] sm:$0xff]  ;;  %v5909_v11 = vld [vmem:[%s7395_s2 + $0xe8] sm:$0xff] }
  0x17   : > { %2149 = vmatpush.bf16.msra.mxu3 %v5911_v3  ;;  %v5884_v12 = vld [vmem:[%s7395_s2 + $0x20] sm:$0xff]  ;;  %v5883_v16 = vld [vmem:[%s7395_s2 + $0x18] sm:$0xff]  ;;  %v5882_v20 = vld [vmem:[%s7395_s2 + $0x10] sm:$0xff] }
  0x18   : > { %2111 = vmatpush.bf16.msra.mxu0 %v5886_v4  ;;  %v5892_v13 = vld [vmem:[%s7395_s2 + $0x60] sm:$0xff]  ;;  %v5891_v17 = vld [vmem:[%s7395_s2 + $0x58] sm:$0xff]  ;;  %v5890_v22 = vld [vmem:[%s7395_s2 + $0x50] sm:$0xff] }
  0x19   : > { %2124 = vmatpush.bf16.msra.mxu1 %v5894_v5  ;;  %v5900_v14 = vld [vmem:[%s7395_s2 + $0xa0] sm:$0xff]  ;;  %v5899_v18 = vld [vmem:[%s7395_s2 + $0x98] sm:$0xff]  ;;  %v5898_v23 = vld [vmem:[%s7395_s2 + $0x90] sm:$0xff] }
  0x1a   : > { %2137 = vmatpush.bf16.msra.mxu2 %v5902_v6  ;;  %v5908_v15 = vld [vmem:[%s7395_s2 + $0xe0] sm:$0xff]  ;;  %v5907_v19 = vld [vmem:[%s7395_s2 + $0xd8] sm:$0xff]  ;;  %v5906_v24 = vld [vmem:[%s7395_s2 + $0xd0] sm:$0xff] }
  0x1b   : > { %2150 = vmatpush.bf16.msra.mxu3 %v5910_v7  ;;  %v513_v21 = vld [vmem:[%s7393_s0] sm:$0xff]  ;;  %v5881_v25 = vld [vmem:[%s7395_s2 + $0x8] sm:$0xff]  ;;  %v5919_v32 = vld [vmem:[%s7395_s2 + $0x138] sm:$0xff] }
  0x1c   : > { %2112 = vmatpush.bf16.msra.mxu0 %v5885_v8  ;;  %905 = vst [vmem:[#allocation1] ss:$9 sm:$0xff] %v513_v21  ;;  %v5889_v26 = vld [vmem:[%s7395_s2 + $0x48] sm:$0xff]  ;;  %v5880_v29 = vld [vmem:[%s7395_s2] sm:$0xff]  ;;  %v5927_v33 = vld [vmem:[%s7395_s2 + $0x178] sm:$0xff] }
  0x1d   : > { %2125 = vmatpush.bf16.msra.mxu1 %v5893_v9  ;;  %v5897_v27 = vld [vmem:[%s7395_s2 + $0x88] sm:$0xff]  ;;  %v5888_v30 = vld [vmem:[%s7395_s2 + $0x40] sm:$0xff]  ;;  %v5935_v34 = vld [vmem:[%s7395_s2 + $0x1b8] sm:$0xff] }
  0x1e   : > { %2138 = vmatpush.bf16.msra.mxu2 %v5901_v10  ;;  %v5905_v28 = vld [vmem:[%s7395_s2 + $0xc8] sm:$0xff]  ;;  %v5896_v31 = vld [vmem:[%s7395_s2 + $0x80] sm:$0xff]  ;;  %v5943_v36 = vld [vmem:[%s7395_s2 + $0x1f8] sm:$0xff] }
  0x1f   : > { %2151 = vmatpush.bf16.msra.mxu3 %v5909_v11  ;;  %v5904_v35 = vld [vmem:[%s7395_s2 + $0xc0] sm:$0xff]  ;;  %v5918_v38 = vld [vmem:[%s7395_s2 + $0x130] sm:$0xff]  ;;  %v5917_v44 = vld [vmem:[%s7395_s2 + $0x128] sm:$0xff] }
  0x20   : > { %2113 = vmatpush.bf16.msra.mxu0 %v5884_v12  ;;  %v5926_v40 = vld [vmem:[%s7395_s2 + $0x170] sm:$0xff]  ;;  %v514_v49 = vld [vmem:[%s7393_s0 + $0x8] sm:$0xff]  ;;  %v5916_v54 = vld [vmem:[%s7395_s2 + $0x120] sm:$0xff] }
  0x21   : > { %2126 = vmatpush.bf16.msra.mxu1 %v5892_v13  ;;  %v5934_v41 = vld [vmem:[%s7395_s2 + $0x1b0] sm:$0xff]  ;;  %v5925_v51 = vld [vmem:[%s7395_s2 + $0x168] sm:$0xff]  ;;  %v5924_v55 = vld [vmem:[%s7395_s2 + $0x160] sm:$0xff] }
  0x22   : > { %2139 = vmatpush.bf16.msra.mxu2 %v5900_v14  ;;  %v5942_v43 = vld [vmem:[%s7395_s2 + $0x1f0] sm:$0xff]  ;;  %v5933_v52 = vld [vmem:[%s7395_s2 + $0x1a8] sm:$0xff]  ;;  %v5932_v56 = vld [vmem:[%s7395_s2 + $0x1a0] sm:$0xff] }
  0x23   : > { %2152 = vmatpush.bf16.msra.mxu3 %v5908_v15  ;;  %v906_v37 = vld [vmem:[#allocation1] sm:$0xff]  ;;  %v908_v39 = vld [vmem:[#allocation1 + $0x12] sm:$0xff]  ;;  %v907_v42 = vld [vmem:[#allocation1 + $0x9] sm:$0xff] }
  0x24   : > { %2114 = vmatpush.bf16.msra.mxu0 %v5883_v16  ;;  %v909_v45 = vld [vmem:[#allocation1 + $0x1b] sm:$0xff]  ;;  %v6515_v47 = vld [vmem:[#allocation1 + $0x24] sm:$0xff]  ;;  %v6522_v50 = vld [vmem:[#allocation1 + $0x2d] sm:$0xff] }
  0x25   : > { %2127 = vmatpush.bf16.msra.mxu1 %v5891_v17  ;;  %v6513_v46 = vld [vmem:[#allocation1 + $0x36] sm:$0xff]  ;;  %v6517_v48 = vld [vmem:[#allocation1 + $0x3f] sm:$0xff]  ;;  %v5941_v53 = vld [vmem:[%s7395_s2 + $0x1e8] sm:$0xff] }
  0x26   : > { %2140 = vmatpush.bf16.msra.mxu2 %v5899_v18  ;;  %915 = vst [vmem:[#allocation1] ss:$9 sm:$0xff] %v514_v49  ;;  %v5940_v57 = vld [vmem:[%s7395_s2 + $0x1e0] sm:$0xff]  ;;  %v5915_v58 = vld [vmem:[%s7395_s2 + $0x118] sm:$0xff]  ;;  %v5914_v62 = vld [vmem:[%s7395_s2 + $0x110] sm:$0xff] }
  0x27   : > { %2153 = vmatpush.bf16.msra.mxu3 %v5907_v19  ;;  %v5923_v59 = vld [vmem:[%s7395_s2 + $0x158] sm:$0xff]  ;;  %v5922_v63 = vld [vmem:[%s7395_s2 + $0x150] sm:$0xff]  ;;  %v5913_v2 = vld [vmem:[%s7395_s2 + $0x108] sm:$0xff] }
  0x28   : > { %2115 = vmatpush.bf16.msra.mxu0 %v5882_v20  ;;  %v5931_v60 = vld [vmem:[%s7395_s2 + $0x198] sm:$0xff]  ;;  %v5930_v0 = vld [vmem:[%s7395_s2 + $0x190] sm:$0xff]  ;;  %v5921_v3 = vld [vmem:[%s7395_s2 + $0x148] sm:$0xff] }
  0x29   : > { %2128 = vmatpush.bf16.msra.mxu1 %v5890_v22  ;;  %v5939_v61 = vld [vmem:[%s7395_s2 + $0x1d8] sm:$0xff]  ;;  %v5938_v1 = vld [vmem:[%s7395_s2 + $0x1d0] sm:$0xff]  ;;  %v5929_v4 = vld [vmem:[%s7395_s2 + $0x188] sm:$0xff] }
  0x2a   : > { %2141 = vmatpush.bf16.msra.mxu2 %v5898_v23  ;;  %v5937_v5 = vld [vmem:[%s7395_s2 + $0x1c8] sm:$0xff]  ;;  %v5912_v6 = vld [vmem:[%s7395_s2 + $0x100] sm:$0xff]  ;;  %v5951_v9 = vld [vmem:[%s7395_s2 + $0x238] sm:$0xff] }
  0x2b   : > { %2154 = vmatpush.bf16.msra.mxu3 %v5906_v24  ;;  %v5920_v7 = vld [vmem:[%s7395_s2 + $0x140] sm:$0xff]  ;;  %v5959_v10 = vld [vmem:[%s7395_s2 + $0x278] sm:$0xff]  ;;  %v5950_v14 = vld [vmem:[%s7395_s2 + $0x230] sm:$0xff] }
  0x2c   : > { %2116 = vmatpush.bf16.msra.mxu0 %v5881_v25  ;;  %v5928_v8 = vld [vmem:[%s7395_s2 + $0x180] sm:$0xff]  ;;  %v5967_v11 = vld [vmem:[%s7395_s2 + $0x2b8] sm:$0xff]  ;;  %v5958_v15 = vld [vmem:[%s7395_s2 + $0x270] sm:$0xff] }
  0x2d   : > { %2129 = vmatpush.bf16.msra.mxu1 %v5889_v26  ;;  %v5936_v12 = vld [vmem:[%s7395_s2 + $0x1c0] sm:$0xff]  ;;  %v5975_v13 = vld [vmem:[%s7395_s2 + $0x2f8] sm:$0xff]  ;;  %v5966_v16 = vld [vmem:[%s7395_s2 + $0x2b0] sm:$0xff] }
  0x2e   : > { %2142 = vmatpush.bf16.msra.mxu2 %v5897_v27  ;;  %v5974_v17 = vld [vmem:[%s7395_s2 + $0x2f0] sm:$0xff]  ;;  %v5949_v18 = vld [vmem:[%s7395_s2 + $0x228] sm:$0xff]  ;;  %v5948_v22 = vld [vmem:[%s7395_s2 + $0x220] sm:$0xff] }
  0x2f   : > { %2155 = vmatpush.bf16.msra.mxu3 %v5905_v28  ;;  %v5957_v19 = vld [vmem:[%s7395_s2 + $0x268] sm:$0xff]  ;;  %v5956_v23 = vld [vmem:[%s7395_s2 + $0x260] sm:$0xff]  ;;  %v5947_v26 = vld [vmem:[%s7395_s2 + $0x218] sm:$0xff] }
  0x30   : > { %2117 = vmatpush.bf16.msra.mxu0 %v5880_v29  ;;  %v5965_v20 = vld [vmem:[%s7395_s2 + $0x2a8] sm:$0xff]  ;;  %v5964_v24 = vld [vmem:[%s7395_s2 + $0x2a0] sm:$0xff]  ;;  %v5955_v27 = vld [vmem:[%s7395_s2 + $0x258] sm:$0xff] }
  0x31   : > { %2130 = vmatpush.bf16.msra.mxu1 %v5888_v30  ;;  %v5973_v21 = vld [vmem:[%s7395_s2 + $0x2e8] sm:$0xff]  ;;  %v5972_v25 = vld [vmem:[%s7395_s2 + $0x2e0] sm:$0xff]  ;;  %v5963_v28 = vld [vmem:[%s7395_s2 + $0x298] sm:$0xff] }
  0x32   : > { %2143 = vmatpush.bf16.msra.mxu2 %v5896_v31  ;;  %v5971_v29 = vld [vmem:[%s7395_s2 + $0x2d8] sm:$0xff]  ;;  %v5946_v30 = vld [vmem:[%s7395_s2 + $0x210] sm:$0xff] }
  0x33   : > { %2156 = vmatpush.bf16.msra.mxu3 %v5904_v35  ;;  %2118 = vmatmul.bf16.vlgmr.msra.gmra.mxu0 %v906_v37  ;;  %v5954_v31 = vld [vmem:[%s7395_s2 + $0x250] sm:$0xff]  ;;  %v5953_v35 = vld [vmem:[%s7395_s2 + $0x248] sm:$0xff] }
  0x34   : > { %2162 = vmatpush.bf16.msrb.mxu0 %v5919_v32  ;;  %2131 = vmatmul.bf16.vlgmr.msra.gmra.mxu1 %v907_v42  ;;  %v5962_v32 = vld [vmem:[%s7395_s2 + $0x290] sm:$0xff]  ;;  %v5969_v37 = vld [vmem:[%s7395_s2 + $0x2c8] sm:$0xff]  ;;  %v5991_v42 = vld [vmem:[%s7395_s2 + $0x378] sm:$0xff] }
  0x35   : > { %2175 = vmatpush.bf16.msrb.mxu1 %v5927_v33  ;;  %2144 = vmatmul.bf16.vlgmr.msra.gmra.mxu2 %v908_v39  ;;  %v5970_v33 = vld [vmem:[%s7395_s2 + $0x2d0] sm:$0xff]  ;;  %v5952_v39 = vld [vmem:[%s7395_s2 + $0x240] sm:$0xff] }
  0x36   : > { %2188 = vmatpush.bf16.msrb.mxu2 %v5935_v34  ;;  %2157 = vmatmul.bf16.vlgmr.msra.gmra.mxu3 %v909_v45  ;;  %v5945_v34 = vld [vmem:[%s7395_s2 + $0x208] sm:$0xff]  ;;  %v916_v45 = vld [vmem:[#allocation1] sm:$0xff] }
  0x37   : > { %2201 = vmatpush.bf16.msrb.mxu3 %v5943_v36  ;;  %v5961_v36 = vld [vmem:[%s7395_s2 + $0x288] sm:$0xff] }
  0x38   : > { %2163 = vmatpush.bf16.msrb.mxu0 %v5918_v38  ;;  %v5944_v38 = vld [vmem:[%s7395_s2 + $0x200] sm:$0xff]  ;;  %v917_v49 = vld [vmem:[#allocation1 + $0x9] sm:$0xff] }
  0x39   : > { %2176 = vmatpush.bf16.msrb.mxu1 %v5926_v40  ;;  %v5960_v40 = vld [vmem:[%s7395_s2 + $0x280] sm:$0xff] }
  0x3a   : > { %2189 = vmatpush.bf16.msrb.mxu2 %v5934_v41  ;;  %v5983_v41 = vld [vmem:[%s7395_s2 + $0x338] sm:$0xff] }
  0x3b   : > { %2202 = vmatpush.bf16.msrb.mxu3 %v5942_v43  ;;  %v5999_v43 = vld [vmem:[%s7395_s2 + $0x3b8] sm:$0xff] }
  0x3c   : > { %2164 = vmatpush.bf16.msrb.mxu0 %v5917_v44  ;;  %v5968_v44 = vld [vmem:[%s7395_s2 + $0x2c0] sm:$0xff] }
  0x3d   : > { %2177 = vmatpush.bf16.msrb.mxu1 %v5925_v51  ;;  %v919_v51 = vld [vmem:[#allocation1 + $0x1b] sm:$0xff] }
  0x3e   : > { %2190 = vmatpush.bf16.msrb.mxu2 %v5933_v52  ;;  %v5998_v52 = vld [vmem:[%s7395_s2 + $0x3b0] sm:$0xff] }
  0x3f   : > { %2203 = vmatpush.bf16.msrb.mxu3 %v5941_v53  ;;  %v6006_v53 = vld [vmem:[%s7395_s2 + $0x3f0] sm:$0xff] }
  0x40   : > { %2165 = vmatpush.bf16.msrb.mxu0 %v5916_v54  ;;  %v5981_v54 = vld [vmem:[%s7395_s2 + $0x328] sm:$0xff] }
  0x41   : > { %2178 = vmatpush.bf16.msrb.mxu1 %v5924_v55  ;;  %v5989_v55 = vld [vmem:[%s7395_s2 + $0x368] sm:$0xff] }
  0x42   : > { %2191 = vmatpush.bf16.msrb.mxu2 %v5932_v56  ;;  %v5997_v56 = vld [vmem:[%s7395_s2 + $0x3a8] sm:$0xff] }
  0x43   : > { %2204 = vmatpush.bf16.msrb.mxu3 %v5940_v57  ;;  %v6005_v57 = vld [vmem:[%s7395_s2 + $0x3e8] sm:$0xff] }
  0x44   : > { %2166 = vmatpush.bf16.msrb.mxu0 %v5915_v58  ;;  %v5980_v58 = vld [vmem:[%s7395_s2 + $0x320] sm:$0xff] }
  0x45   : > { %2179 = vmatpush.bf16.msrb.mxu1 %v5923_v59  ;;  %v5988_v59 = vld [vmem:[%s7395_s2 + $0x360] sm:$0xff] }
  0x46   : > { %2192 = vmatpush.bf16.msrb.mxu2 %v5931_v60  ;;  %v5996_v60 = vld [vmem:[%s7395_s2 + $0x3a0] sm:$0xff] }
  0x47   : > { %2205 = vmatpush.bf16.msrb.mxu3 %v5939_v61  ;;  %v6004_v61 = vld [vmem:[%s7395_s2 + $0x3e0] sm:$0xff] }
  0x48   : > { %2167 = vmatpush.bf16.msrb.mxu0 %v5914_v62  ;;  %v5979_v62 = vld [vmem:[%s7395_s2 + $0x318] sm:$0xff] }
  0x49   : > { %2180 = vmatpush.bf16.msrb.mxu1 %v5922_v63  ;;  %v5987_v63 = vld [vmem:[%s7395_s2 + $0x358] sm:$0xff] }
  0x4a   : > { %2193 = vmatpush.bf16.msrb.mxu2 %v5930_v0  ;;  %v5995_v0 = vld [vmem:[%s7395_s2 + $0x398] sm:$0xff] }
  0x4b   : > { %2206 = vmatpush.bf16.msrb.mxu3 %v5938_v1  ;;  %v6003_v1 = vld [vmem:[%s7395_s2 + $0x3d8] sm:$0xff] }
  0x4c   : > { %2168 = vmatpush.bf16.msrb.mxu0 %v5913_v2  ;;  %v5978_v2 = vld [vmem:[%s7395_s2 + $0x310] sm:$0xff] }
  0x4d   : > { %2181 = vmatpush.bf16.msrb.mxu1 %v5921_v3  ;;  %v5986_v3 = vld [vmem:[%s7395_s2 + $0x350] sm:$0xff] }
  0x4e   : > { %2194 = vmatpush.bf16.msrb.mxu2 %v5929_v4  ;;  %v5994_v4 = vld [vmem:[%s7395_s2 + $0x390] sm:$0xff] }
  0x4f   : > { %2207 = vmatpush.bf16.msrb.mxu3 %v5937_v5  ;;  %v6002_v5 = vld [vmem:[%s7395_s2 + $0x3d0] sm:$0xff] }
  0x50   : > { %2169 = vmatpush.bf16.msrb.mxu0 %v5912_v6  ;;  %v5977_v6 = vld [vmem:[%s7395_s2 + $0x308] sm:$0xff] }
  0x51   : > { %2182 = vmatpush.bf16.msrb.mxu1 %v5920_v7  ;;  %v5985_v7 = vld [vmem:[%s7395_s2 + $0x348] sm:$0xff] }
  0x52   : > { %2195 = vmatpush.bf16.msrb.mxu2 %v5928_v8  ;;  %v5993_v8 = vld [vmem:[%s7395_s2 + $0x388] sm:$0xff] }
  0x53   : > { %2208 = vmatpush.bf16.msrb.mxu3 %v5936_v12  ;;  %2170 = vmatmul.bf16.vlgmr.msrb.gmra.mxu0 %v6515_v47  ;;  %v918_v47 = vld [vmem:[#allocation1 + $0x12] sm:$0xff]  ;;  %v923_v12 = vld [vmem:[#allocation1 + $0x3f] sm:$0xff] }
  0x54   : > { %2214 = vmatpush.bf16.msra.mxu0 %v5951_v9  ;;  %2183 = vmatmul.bf16.vlgmr.msrb.gmra.mxu1 %v6522_v50  ;;  %v5990_v50 = vld [vmem:[%s7395_s2 + $0x370] sm:$0xff]  ;;  %v920_v9 = vld [vmem:[#allocation1 + $0x24] sm:$0xff] }
  0x55   : > { %2227 = vmatpush.bf16.msra.mxu1 %v5959_v10  ;;  %2196 = vmatmul.bf16.vlgmr.msrb.gmra.mxu2 %v6513_v46  ;;  %v6007_v46 = vld [vmem:[%s7395_s2 + $0x3f8] sm:$0xff] }
  0x56   : > { %2240 = vmatpush.bf16.msra.mxu2 %v5967_v11  ;;  %2209 = vmatmul.bf16.vlgmr.msrb.gmra.mxu3 %v6517_v48  ;;  %v5982_v48 = vld [vmem:[%s7395_s2 + $0x330] sm:$0xff] }
  0x57   : > { %2253 = vmatpush.bf16.msra.mxu3 %v5975_v13  ;;  %v922_v10 = vld [vmem:[#allocation1 + $0x36] sm:$0xff]  ;;  %v921_v11 = vld [vmem:[#allocation1 + $0x2d] sm:$0xff] }
  0x58   : > { %2215 = vmatpush.bf16.msra.mxu0 %v5950_v14  ;;  %v515_v13 = vld [vmem:[%s7393_s0 + $0x10] sm:$0xff]  ;;  %v6001_v14 = vld [vmem:[%s7395_s2 + $0x3c8] sm:$0xff] }
  0x59   : > { %2228 = vmatpush.bf16.msra.mxu1 %v5958_v15  ;;  %925 = vst [vmem:[#allocation1] ss:$9 sm:$0xff] %v515_v13  ;;  %v5976_v15 = vld [vmem:[%s7395_s2 + $0x300] sm:$0xff]  ;;  %v6051_v13 = vld [vmem:[%s7395_s2 + $0x558] sm:$0xff] }
  0x5a   : > { %2241 = vmatpush.bf16.msra.mxu2 %v5966_v16  ;;  %v5984_v16 = vld [vmem:[%s7395_s2 + $0x340] sm:$0xff] }
  0x5b   : > { %2254 = vmatpush.bf16.msra.mxu3 %v5974_v17  ;;  %v6015_v17 = vld [vmem:[%s7395_s2 + $0x438] sm:$0xff] }
  0x5c   : > { %2216 = vmatpush.bf16.msra.mxu0 %v5949_v18  ;;  %v5992_v18 = vld [vmem:[%s7395_s2 + $0x380] sm:$0xff] }
  0x5d   : > { %2229 = vmatpush.bf16.msra.mxu1 %v5957_v19  ;;  %v6023_v19 = vld [vmem:[%s7395_s2 + $0x478] sm:$0xff] }
  0x5e   : > { %2242 = vmatpush.bf16.msra.mxu2 %v5965_v20  ;;  %v6031_v20 = vld [vmem:[%s7395_s2 + $0x4b8] sm:$0xff] }
  0x5f   : > { %2255 = vmatpush.bf16.msra.mxu3 %v5973_v21  ;;  %v6000_v21 = vld [vmem:[%s7395_s2 + $0x3c0] sm:$0xff] }
  0x60   : > { %2217 = vmatpush.bf16.msra.mxu0 %v5948_v22  ;;  %v6039_v22 = vld [vmem:[%s7395_s2 + $0x4f8] sm:$0xff] }
  0x61   : > { %2230 = vmatpush.bf16.msra.mxu1 %v5956_v23  ;;  %v6014_v23 = vld [vmem:[%s7395_s2 + $0x430] sm:$0xff] }
  0x62   : > { %2243 = vmatpush.bf16.msra.mxu2 %v5964_v24  ;;  %v6022_v24 = vld [vmem:[%s7395_s2 + $0x470] sm:$0xff] }
  0x63   : > { %2256 = vmatpush.bf16.msra.mxu3 %v5972_v25  ;;  %v6030_v25 = vld [vmem:[%s7395_s2 + $0x4b0] sm:$0xff] }
  0x64   : > { %2218 = vmatpush.bf16.msra.mxu0 %v5947_v26  ;;  %v6038_v26 = vld [vmem:[%s7395_s2 + $0x4f0] sm:$0xff] }
  0x65   : > { %2231 = vmatpush.bf16.msra.mxu1 %v5955_v27  ;;  %v6013_v27 = vld [vmem:[%s7395_s2 + $0x428] sm:$0xff] }
  0x66   : > { %2244 = vmatpush.bf16.msra.mxu2 %v5963_v28  ;;  %v6021_v28 = vld [vmem:[%s7395_s2 + $0x468] sm:$0xff] }
  0x67   : > { %2257 = vmatpush.bf16.msra.mxu3 %v5971_v29  ;;  %v6029_v29 = vld [vmem:[%s7395_s2 + $0x4a8] sm:$0xff] }
  0x68   : > { %2219 = vmatpush.bf16.msra.mxu0 %v5946_v30  ;;  %v6037_v30 = vld [vmem:[%s7395_s2 + $0x4e8] sm:$0xff] }
  0x69   : > { %2232 = vmatpush.bf16.msra.mxu1 %v5954_v31  ;;  %v6012_v31 = vld [vmem:[%s7395_s2 + $0x420] sm:$0xff] }
  0x6a   : > { %2245 = vmatpush.bf16.msra.mxu2 %v5962_v32  ;;  %v6020_v32 = vld [vmem:[%s7395_s2 + $0x460] sm:$0xff] }
  0x6b   : > { %2258 = vmatpush.bf16.msra.mxu3 %v5970_v33  ;;  %v6028_v33 = vld [vmem:[%s7395_s2 + $0x4a0] sm:$0xff] }
  0x6c   : > { %2220 = vmatpush.bf16.msra.mxu0 %v5945_v34  ;;  %v6036_v34 = vld [vmem:[%s7395_s2 + $0x4e0] sm:$0xff] }
  0x6d   : > { %2233 = vmatpush.bf16.msra.mxu1 %v5953_v35  ;;  %v6011_v35 = vld [vmem:[%s7395_s2 + $0x418] sm:$0xff] }
  0x6e   : > { %2246 = vmatpush.bf16.msra.mxu2 %v5961_v36  ;;  %v6019_v36 = vld [vmem:[%s7395_s2 + $0x458] sm:$0xff] }
  0x6f   : > { %2259 = vmatpush.bf16.msra.mxu3 %v5969_v37  ;;  %v6027_v37 = vld [vmem:[%s7395_s2 + $0x498] sm:$0xff] }
  0x70   : > { %2221 = vmatpush.bf16.msra.mxu0 %v5944_v38  ;;  %v6035_v38 = vld [vmem:[%s7395_s2 + $0x4d8] sm:$0xff] }
  0x71   : > { %2234 = vmatpush.bf16.msra.mxu1 %v5952_v39  ;;  %v6010_v39 = vld [vmem:[%s7395_s2 + $0x410] sm:$0xff] }
  0x72   : > { %2247 = vmatpush.bf16.msra.mxu2 %v5960_v40  ;;  %v6018_v40 = vld [vmem:[%s7395_s2 + $0x450] sm:$0xff] }
  0x73   : > { %2260 = vmatpush.bf16.msra.mxu3 %v5968_v44  ;;  %2222 = vmatmul.bf16.vlgmr.msra.gmra.mxu0 %v916_v45  ;;  %v6017_v44 = vld [vmem:[%s7395_s2 + $0x448] sm:$0xff] }
  0x74   : > { %2266 = vmatpush.bf16.msrb.mxu0 %v5983_v41  ;;  %2235 = vmatmul.bf16.vlgmr.msra.gmra.mxu1 %v917_v49  ;;  %v6026_v41 = vld [vmem:[%s7395_s2 + $0x490] sm:$0xff]  ;;  %v6025_v45 = vld [vmem:[%s7395_s2 + $0x488] sm:$0xff]  ;;  %v6024_v49 = vld [vmem:[%s7395_s2 + $0x480] sm:$0xff] }
  0x75   : > { %2279 = vmatpush.bf16.msrb.mxu1 %v5991_v42  ;;  %2248 = vmatmul.bf16.vlgmr.msra.gmra.mxu2 %v918_v47  ;;  %v6034_v42 = vld [vmem:[%s7395_s2 + $0x4d0] sm:$0xff]  ;;  %v6008_v47 = vld [vmem:[%s7395_s2 + $0x400] sm:$0xff] }
  0x76   : > { %2292 = vmatpush.bf16.msrb.mxu2 %v5999_v43  ;;  %2261 = vmatmul.bf16.vlgmr.msra.gmra.mxu3 %v919_v51  ;;  %v6009_v43 = vld [vmem:[%s7395_s2 + $0x408] sm:$0xff]  ;;  %v6055_v51 = vld [vmem:[%s7395_s2 + $0x578] sm:$0xff] }
  0x77   : > { %2305 = vmatpush.bf16.msrb.mxu3 %v6007_v46  ;;  %v6033_v46 = vld [vmem:[%s7395_s2 + $0x4c8] sm:$0xff] }
  0x78   : > { %2267 = vmatpush.bf16.msrb.mxu0 %v5982_v48  ;;  %v6016_v48 = vld [vmem:[%s7395_s2 + $0x440] sm:$0xff] }
  0x79   : > { %2280 = vmatpush.bf16.msrb.mxu1 %v5990_v50  ;;  %v6047_v50 = vld [vmem:[%s7395_s2 + $0x538] sm:$0xff] }
  0x7a   : > { %2293 = vmatpush.bf16.msrb.mxu2 %v5998_v52  ;;  %v6063_v52 = vld [vmem:[%s7395_s2 + $0x5b8] sm:$0xff] }
  0x7b   : > { %2306 = vmatpush.bf16.msrb.mxu3 %v6006_v53  ;;  %v6032_v53 = vld [vmem:[%s7395_s2 + $0x4c0] sm:$0xff] }
  0x7c   : > { %2268 = vmatpush.bf16.msrb.mxu0 %v5981_v54  ;;  %v926_v54 = vld [vmem:[#allocation1] sm:$0xff] }
  0x7d   : > { %2281 = vmatpush.bf16.msrb.mxu1 %v5989_v55  ;;  %v928_v55 = vld [vmem:[#allocation1 + $0x12] sm:$0xff] }
  0x7e   : > { %2294 = vmatpush.bf16.msrb.mxu2 %v5997_v56  ;;  %v6071_v56 = vld [vmem:[%s7395_s2 + $0x5f8] sm:$0xff] }
  0x7f   : > { %2307 = vmatpush.bf16.msrb.mxu3 %v6005_v57  ;;  %v927_v57 = vld [vmem:[#allocation1 + $0x9] sm:$0xff] }
  0x80   : > { %2269 = vmatpush.bf16.msrb.mxu0 %v5980_v58  ;;  %v6046_v58 = vld [vmem:[%s7395_s2 + $0x530] sm:$0xff] }
  0x81   : > { %2282 = vmatpush.bf16.msrb.mxu1 %v5988_v59  ;;  %v929_v59 = vld [vmem:[#allocation1 + $0x1b] sm:$0xff] }
  0x82   : > { %2295 = vmatpush.bf16.msrb.mxu2 %v5996_v60  ;;  %v6054_v60 = vld [vmem:[%s7395_s2 + $0x570] sm:$0xff] }
  0x83   : > { %2308 = vmatpush.bf16.msrb.mxu3 %v6004_v61  ;;  %v6062_v61 = vld [vmem:[%s7395_s2 + $0x5b0] sm:$0xff] }
  0x84   : > { %2270 = vmatpush.bf16.msrb.mxu0 %v5979_v62  ;;  %v6070_v62 = vld [vmem:[%s7395_s2 + $0x5f0] sm:$0xff] }
  0x85   : > { %2283 = vmatpush.bf16.msrb.mxu1 %v5987_v63  ;;  %v6045_v63 = vld [vmem:[%s7395_s2 + $0x528] sm:$0xff] }
  0x86   : > { %2296 = vmatpush.bf16.msrb.mxu2 %v5995_v0  ;;  %v6053_v0 = vld [vmem:[%s7395_s2 + $0x568] sm:$0xff] }
  0x87   : > { %2309 = vmatpush.bf16.msrb.mxu3 %v6003_v1  ;;  %v6061_v1 = vld [vmem:[%s7395_s2 + $0x5a8] sm:$0xff] }
  0x88   : > { %2271 = vmatpush.bf16.msrb.mxu0 %v5978_v2  ;;  %v6236_v2 = vld [vmem:[%s7396_s3] ss:$0 sm:$0xff] }
  0x89   : > { %2284 = vmatpush.bf16.msrb.mxu1 %v5986_v3  ;;  %v6069_v3 = vld [vmem:[%s7395_s2 + $0x5e8] sm:$0xff] }
  0x8a   : > { %2297 = vmatpush.bf16.msrb.mxu2 %v5994_v4  ;;  %v6044_v4 = vld [vmem:[%s7395_s2 + $0x520] sm:$0xff] }
  0x8b   : > { %2310 = vmatpush.bf16.msrb.mxu3 %v6002_v5 }
  0x8c   : > { %2272 = vmatpush.bf16.msrb.mxu0 %v5977_v6  ;;  %v6052_v6 = vld [vmem:[%s7395_s2 + $0x560] sm:$0xff] }
  0x8d   : > { %2285 = vmatpush.bf16.msrb.mxu1 %v5985_v7  ;;  %v6060_v7 = vld [vmem:[%s7395_s2 + $0x5a0] sm:$0xff] }
  0x8e   : > { %2298 = vmatpush.bf16.msrb.mxu2 %v5993_v8 }
  0x8f   : > { %2311 = vmatpush.bf16.msrb.mxu3 %v6001_v14  ;;  %v6059_v14 = vld [vmem:[%s7395_s2 + $0x598] sm:$0xff] }
  0x90   : > { %2273 = vmatpush.bf16.msrb.mxu0 %v5976_v15  ;;  %v6067_v15 = vld [vmem:[%s7395_s2 + $0x5d8] sm:$0xff] }
  0x91   : > { %2286 = vmatpush.bf16.msrb.mxu1 %v5984_v16 }
  0x92   : > { %2299 = vmatpush.bf16.msrb.mxu2 %v5992_v18 }
  0x93   : > { %2312 = vmatpush.bf16.msrb.mxu3 %v6000_v21  ;;  %2274 = vmatmul.bf16.vlgmr.msrb.gmra.mxu0 %v920_v9  ;;  %v6058_v21 = vld [vmem:[%s7395_s2 + $0x590] sm:$0xff] }
  0x94   : > { %2318 = vmatpush.bf16.msra.mxu0 %v6015_v17  ;;  %2287 = vmatmul.bf16.vlgmr.msrb.gmra.mxu1 %v921_v11  ;;  %v6042_v17 = vld [vmem:[%s7395_s2 + $0x510] sm:$0xff] }
  0x95   : > { %2331 = vmatpush.bf16.msra.mxu1 %v6023_v19  ;;  %2300 = vmatmul.bf16.vlgmr.msrb.gmra.mxu2 %v922_v10  ;;  %v6068_v10 = vld [vmem:[%s7395_s2 + $0x5e0] sm:$0xff] }
  0x96   : > { %2344 = vmatpush.bf16.msra.mxu2 %v6031_v20  ;;  %2313 = vmatmul.bf16.vlgmr.msrb.gmra.mxu3 %v923_v12  ;;  %v6043_v12 = vld [vmem:[%s7395_s2 + $0x518] sm:$0xff]  ;;  %v6050_v20 = vld [vmem:[%s7395_s2 + $0x550] sm:$0xff] }
  0x97   : > { %2357 = vmatpush.bf16.msra.mxu3 %v6039_v22 }
  0x98   : > { %2319 = vmatpush.bf16.msra.mxu0 %v6014_v23 }
  0x99   : > { %2332 = vmatpush.bf16.msra.mxu1 %v6022_v24  ;;  %v6066_v24 = vld [vmem:[%s7395_s2 + $0x5d0] sm:$0xff] }
  0x9a   : > { %2345 = vmatpush.bf16.msra.mxu2 %v6030_v25 }
  0x9b   : > { %2358 = vmatpush.bf16.msra.mxu3 %v6038_v26  ;;  %v6041_v26 = vld [vmem:[%s7395_s2 + $0x508] sm:$0xff] }
  0x9c   : > { %2320 = vmatpush.bf16.msra.mxu0 %v6013_v27  ;;  %v5284_v27 = vld [vmem:[%s7399_s6] sm:$0xf] }
  0x9d   : > { %2333 = vmatpush.bf16.msra.mxu1 %v6021_v28  ;;  %v6080_v28 = vld [vmem:[%s7399_s6] sm:$0x30] }
  0x9e   : > { %2346 = vmatpush.bf16.msra.mxu2 %v6029_v29  ;;  %v6049_v29 = vld [vmem:[%s7395_s2 + $0x548] sm:$0xff] }
  0x9f   : > { %2359 = vmatpush.bf16.msra.mxu3 %v6037_v30  ;;  %v6057_v30 = vld [vmem:[%s7395_s2 + $0x588] sm:$0xff] }
  0xa0   : > { %2321 = vmatpush.bf16.msra.mxu0 %v6012_v31  ;;  %v6065_v31 = vld [vmem:[%s7395_s2 + $0x5c8] sm:$0xff] }
  0xa1   : > { %2334 = vmatpush.bf16.msra.mxu1 %v6020_v32  ;;  %v5285_v32 = vor.u32 %v6080_v28, %v5284_v27  ;;  %v6083_v28 = vld [vmem:[%s7401_s8 + $0x10] sm:$0xff] }
  0xa2   : > { %2347 = vmatpush.bf16.msra.mxu2 %v6028_v33 }
  0xa3   : > { %2360 = vmatpush.bf16.msra.mxu3 %v6036_v34  ;;  %v6040_v34 = vld [vmem:[%s7395_s2 + $0x500] sm:$0xff] }
  0xa4   : > { %2322 = vmatpush.bf16.msra.mxu0 %v6011_v35  ;;  %v6048_v35 = vld [vmem:[%s7395_s2 + $0x540] sm:$0xff] }
  0xa5   : > { %2335 = vmatpush.bf16.msra.mxu1 %v6019_v36  ;;  %v6056_v36 = vld [vmem:[%s7395_s2 + $0x580] sm:$0xff] }
  0xa6   : > { %2348 = vmatpush.bf16.msra.mxu2 %v6027_v37 }
  0xa7   : > { %2361 = vmatpush.bf16.msra.mxu3 %v6035_v38  ;;  %v6064_v38 = vld [vmem:[%s7395_s2 + $0x5c0] sm:$0xff] }
  0xa8   : > { %2323 = vmatpush.bf16.msra.mxu0 %v6010_v39  ;;  %v2524_v39 = vsel %vm2522_vm0, %v5285_v32, 0 }
  0xa9   : > { %2336 = vmatpush.bf16.msra.mxu1 %v6018_v40  ;;  %v930_v40 = vld [vmem:[#allocation1 + $0x24] sm:$0xff] }
  0xaa   : > { %2349 = vmatpush.bf16.msra.mxu2 %v6026_v41  ;;  %v931_v41 = vld [vmem:[#allocation1 + $0x2d] sm:$0xff] }
  0xab   : > { %2362 = vmatpush.bf16.msra.mxu3 %v6034_v42  ;;  %v932_v42 = vld [vmem:[#allocation1 + $0x36] sm:$0xff] }
  0xac   : > { %2324 = vmatpush.bf16.msra.mxu0 %v6009_v43  ;;  %v933_v43 = vld [vmem:[#allocation1 + $0x3f] sm:$0xff] }
  0xad   : > { %2337 = vmatpush.bf16.msra.mxu1 %v6017_v44 }
  0xae   : > { %2350 = vmatpush.bf16.msra.mxu2 %v6025_v45 }
  0xaf   : > { %2363 = vmatpush.bf16.msra.mxu3 %v6033_v46 }
  0xb0   : > { %2325 = vmatpush.bf16.msra.mxu0 %v6008_v47  ;;  %v2119_v5 = vpop.f32.mrf.mxu0 }
  0xb1   : > { %2338 = vmatpush.bf16.msra.mxu1 %v6016_v48  ;;  %v2120_v8 = vadd.f32 %v6236_v2, %v2119_v5  ;;  %v2132_v9 = vpop.f32.mrf.mxu1 }
  0xb2   : > { %2351 = vmatpush.bf16.msra.mxu2 %v6024_v49  ;;  %v2506_v49 = vld [vmem:[%s7394_s1] sm:$0x1] }
  0xb3   : > { %2364 = vmatpush.bf16.msra.mxu3 %v6032_v53  ;;  %2326 = vmatmul.bf16.vlgmr.msra.gmra.mxu0 %v926_v54  ;;  %v2133_v11 = vadd.f32 %v2132_v9, %v2120_v8  ;;  %v6079_v8 = vld [vmem:[%s7397_s4 + $0x38] sm:$0xff] }
  0xb4   : > { %2370 = vmatpush.bf16.msrb.mxu0 %v6047_v50  ;;  %2339 = vmatmul.bf16.vlgmr.msra.gmra.mxu1 %v927_v57 }
  0xb5   : > { %2383 = vmatpush.bf16.msrb.mxu1 %v6055_v51  ;;  %2352 = vmatmul.bf16.vlgmr.msra.gmra.mxu2 %v928_v55 }
  0xb6   : > { %2396 = vmatpush.bf16.msrb.mxu2 %v6063_v52  ;;  %2365 = vmatmul.bf16.vlgmr.msra.gmra.mxu3 %v929_v59 }
  0xb7   : > { %2409 = vmatpush.bf16.msrb.mxu3 %v6071_v56 }
  0xb8   : > { %2371 = vmatpush.bf16.msrb.mxu0 %v6046_v58  ;;  %v2145_v16 = vpop.f32.mrf.mxu2  ;;  %v2121_v19 = vpop.f32.mrf.mxu0 }
  0xb9   : > { %2384 = vmatpush.bf16.msrb.mxu1 %v6054_v60  ;;  %v2146_v18 = vadd.f32 %v2145_v16, %v2133_v11  ;;  %v2158_v22 = vpop.f32.mrf.mxu3  ;;  %v2134_v23 = vpop.f32.mrf.mxu1  ;;  %v6076_v16 = vld [vmem:[%s7397_s4 + $0x20] sm:$0xff] }
  0xba   : > { %2397 = vmatpush.bf16.msrb.mxu2 %v6062_v61 }
  0xbb   : > { %2410 = vmatpush.bf16.msrb.mxu3 %v6070_v62  ;;  %v2159_v25 = vadd.f32 %v2158_v22, %v2146_v18  ;;  %v6074_v18 = vld [vmem:[%s7397_s4 + $0x10] sm:$0xff]  ;;  %v6084_v22 = vld [vmem:[%s7401_s8 + $0x18] sm:$0xff] }
  0xbc   : > { %2372 = vmatpush.bf16.msrb.mxu0 %v6045_v63 }
  0xbd   : > { %2385 = vmatpush.bf16.msrb.mxu1 %v6053_v0 }
  0xbe   : > { %2398 = vmatpush.bf16.msrb.mxu2 %v6061_v1 }
  0xbf   : > { %2411 = vmatpush.bf16.msrb.mxu3 %v6069_v3 }
  0xc0   : > { %2373 = vmatpush.bf16.msrb.mxu0 %v6044_v4  ;;  %v2147_v33 = vpop.f32.mrf.mxu2 }
  0xc1   : > { %2386 = vmatpush.bf16.msrb.mxu1 %v6052_v6  ;;  %v2160_v37 = vpop.f32.mrf.mxu3 }
  0xc2   : > { %2399 = vmatpush.bf16.msrb.mxu2 %v6060_v7 }
  0xc3   : > { %2412 = vmatpush.bf16.msrb.mxu3 %v6068_v10 }
  0xc4   : > { %2374 = vmatpush.bf16.msrb.mxu0 %v6043_v12  ;;  %v6078_v12 = vld [vmem:[%s7397_s4 + $0x30] sm:$0xff] }
  0xc5   : > { %2387 = vmatpush.bf16.msrb.mxu1 %v6051_v13  ;;  %v6077_v13 = vld [vmem:[%s7397_s4 + $0x28] sm:$0xff] }
  0xc6   : > { %2400 = vmatpush.bf16.msrb.mxu2 %v6059_v14 }
  0xc7   : > { %2413 = vmatpush.bf16.msrb.mxu3 %v6067_v15 }
  0xc8   : > { %2375 = vmatpush.bf16.msrb.mxu0 %v6042_v17  ;;  %v6075_v17 = vld [vmem:[%s7397_s4 + $0x18] sm:$0xff] }
  0xc9   : > { %2388 = vmatpush.bf16.msrb.mxu1 %v6050_v20 }
  0xca   : > { %2401 = vmatpush.bf16.msrb.mxu2 %v6058_v21  ;;  %v6073_v21 = vld [vmem:[%s7397_s4 + $0x8] sm:$0xff] }
  0xcb   : > { %2414 = vmatpush.bf16.msrb.mxu3 %v6066_v24  ;;  %v6072_v24 = vld [vmem:[%s7397_s4] sm:$0xff] }
  0xcc   : > { %2376 = vmatpush.bf16.msrb.mxu0 %v6041_v26 }
  0xcd   : > { %2389 = vmatpush.bf16.msrb.mxu1 %v6049_v29 }
  0xce   : > { %2402 = vmatpush.bf16.msrb.mxu2 %v6057_v30 }
  0xcf   : > { %2415 = vmatpush.bf16.msrb.mxu3 %v6065_v31  ;;  %v6082_v31 = vld [vmem:[%s7401_s8 + $0x8] sm:$0xff] }
  0xd0   : > { %2377 = vmatpush.bf16.msrb.mxu0 %v6040_v34  ;;  %v2171_v44 = vpop.f32.mrf.mxu0 }
  0xd1   : > { %2390 = vmatpush.bf16.msrb.mxu1 %v6048_v35  ;;  %v2184_v45 = vpop.f32.mrf.mxu1  ;;  %v2172_v46 = vadd.f32 %v2171_v44, %v2159_v25  ;;  %v6081_v35 = vld [vmem:[%s7401_s8] sm:$0xff] }
  0xd2   : > { %2403 = vmatpush.bf16.msrb.mxu2 %v6056_v36 }
  0xd3   : > { %2416 = vmatpush.bf16.msrb.mxu3 %v6064_v38  ;;  %2378 = vmatmul.bf16.vlgmr.msrb.gmra.mxu0 %v930_v40  ;;  %v2185_v47 = vadd.f32 %v2184_v45, %v2172_v46 }
  0xd4   : > { %2391 = vmatmul.bf16.vlgmr.msrb.gmra.mxu1 %v931_v41  ;;  %2491 = vmatpush.bf16.msra.mxu0 %v6079_v8 }
  0xd5   : > { %2533 = vmatpush.bf16.msra.mxu1 %v2524_v39  ;;  %2404 = vmatmul.bf16.vlgmr.msrb.gmra.mxu2 %v932_v42 }
  0xd6   : > { %2417 = vmatmul.bf16.vlgmr.msrb.gmra.mxu3 %v933_v43  ;;  %2585 = vmatpush.bf16.msra.mxu2 %v6084_v22 }
  0xd8   : > { %v2197_v48 = vpop.f32.mrf.mxu2  ;;  %v2173_v52 = vpop.f32.mrf.mxu0  ;;  %2492 = vmatpush.bf16.msra.mxu0 %v6078_v12 }
  0xd9   : > { %v2198_v50 = vadd.f32 %v2197_v48, %v2185_v47  ;;  %v2210_v51 = vpop.f32.mrf.mxu3  ;;  %v2186_v54 = vpop.f32.mrf.mxu1  ;;  %v6237_v52 = vld [vmem:[%s7400_s7] ss:$0 sm:$0xff] }
  0xda   : > { %2586 = vmatpush.bf16.msra.mxu2 %v6083_v28 }
  0xdb   : > { %v2211_v53 = vadd.f32 %v2210_v51, %v2198_v50 }
  0xdc   : > { %2493 = vmatpush.bf16.msra.mxu0 %v6077_v13 }
  0xde   : > { %2587 = vmatpush.bf16.msra.mxu2 %v6082_v31 }
  0xe0   : > { %v2199_v55 = vpop.f32.mrf.mxu2  ;;  %2494 = vmatpush.bf16.msra.mxu0 %v6076_v16 }
  0xe1   : > { %v2212_v56 = vpop.f32.mrf.mxu3 }
  0xe2   : > { %2588 = vmatpush.bf16.msra.mxu2 %v6081_v35 }
  0xe4   : > { %5286 = vmatmul.msk.bf16.vlgmr.msra.gmra.mxu1 %vm2518_vm1, %v2506_v49  ;;  %2495 = vmatpush.bf16.msra.mxu0 %v6075_v17 }
  0xe8   : > { %2496 = vmatpush.bf16.msra.mxu0 %v6074_v18 }
  0xec   : > { %2497 = vmatpush.bf16.msra.mxu0 %v6073_v21 }
  0xf0   : > { %v2223_v57 = vpop.f32.mrf.mxu0  ;;  %2498 = vmatpush.bf16.msra.mxu0 %v6072_v24 }
  0xf1   : > { %v2224_v58 = vadd.f32 %v2223_v57, %v2211_v53  ;;  %v2236_v59 = vpop.f32.mrf.mxu1 }
  0xf3   : > { %v2237_v60 = vadd.f32 %v2236_v59, %v2224_v58 }
  0xf8   : > { %v2249_v61 = vpop.f32.mrf.mxu2  ;;  %v2225_v63 = vpop.f32.mrf.mxu0 }
  0xf9   : > { %v2250_v62 = vadd.f32 %v2249_v61, %v2237_v60  ;;  %v2262_v0 = vpop.f32.mrf.mxu3  ;;  %v2238_v2 = vpop.f32.mrf.mxu1  ;;  %v6282_v60 = vmov 0.0   ;;  %v6238_v61 = vld [vmem:[%s7398_s5] ss:$0 sm:$0xff] }
  0xfa   : > { %2595 = vst.msk [vmem:[#allocation4] sm:$0x3] %vm2504_vm3, %v6282_v60 }
  0xfb   : > { %v2263_v1 = vadd.f32 %v2262_v0, %v2250_v62 }
 0x100   : > { %v2251_v3 = vpop.f32.mrf.mxu2 }
 0x101   : > { %v2264_v4 = vpop.f32.mrf.mxu3 }
 0x110   : > { %v2275_v5 = vpop.f32.mrf.mxu0 }
 0x111   : > { %v2288_v6 = vpop.f32.mrf.mxu1  ;;  %v2276_v25 = vadd.f32 %v2275_v5, %v2263_v1  ;;  %v6239_v1 = vld [vmem:[%s7402_s9] ss:$0 sm:$0xff] }
 0x113   : > { %v2289_v30 = vadd.f32 %v2288_v6, %v2276_v25 }
 0x118   : > { %v2301_v7 = vpop.f32.mrf.mxu2  ;;  %v2277_v10 = vpop.f32.mrf.mxu0 }
 0x119   : > { %v2314_v9 = vpop.f32.mrf.mxu3  ;;  %v2290_v11 = vpop.f32.mrf.mxu1  ;;  %v2302_v32 = vadd.f32 %v2301_v7, %v2289_v30 }
 0x11b   : > { %v2315_v36 = vadd.f32 %v2314_v9, %v2302_v32 }
 0x120   : > { %v2303_v14 = vpop.f32.mrf.mxu2 }
 0x121   : > { %v2316_v15 = vpop.f32.mrf.mxu3 }
 0x130   : > { %v2327_v19 = vpop.f32.mrf.mxu0 }
 0x131   : > { %v2340_v20 = vpop.f32.mrf.mxu1  ;;  %v2328_v37 = vadd.f32 %v2327_v19, %v2315_v36 }
 0x133   : > { %v2341_v38 = vadd.f32 %v2340_v20, %v2328_v37 }
 0x138   : > { %v2353_v23 = vpop.f32.mrf.mxu2  ;;  %v2329_v27 = vpop.f32.mrf.mxu0 }
 0x139   : > { %v2366_v26 = vpop.f32.mrf.mxu3  ;;  %v2342_v29 = vpop.f32.mrf.mxu1  ;;  %v2354_v39 = vadd.f32 %v2353_v23, %v2341_v38 }
 0x13b   : > { %v2367_v40 = vadd.f32 %v2366_v26, %v2354_v39 }
 0x140   : > { %v2355_v33 = vpop.f32.mrf.mxu2 }
 0x141   : > { %v2368_v34 = vpop.f32.mrf.mxu3 }
 0x150   : > { %v2379_v41 = vpop.f32.mrf.mxu0 }
 0x151   : > { %v2392_v42 = vpop.f32.mrf.mxu1  ;;  %v2380_v43 = vadd.f32 %v2379_v41, %v2367_v40 }
 0x153   : > { %v2393_v44 = vadd.f32 %v2392_v42, %v2380_v43 }
 0x158   : > { %v2405_v45 = vpop.f32.mrf.mxu2  ;;  %v2381_v47 = vpop.f32.mrf.mxu0 }
 0x159   : > { %v2406_v46 = vadd.f32 %v2405_v45, %v2393_v44  ;;  %v2394_v48 = vpop.f32.mrf.mxu1  ;;  %v2418_v49 = vpop.f32.mrf.mxu3 }
 0x15b   : > { %v2419_v50 = vadd.f32 %v2418_v49, %v2406_v46 }
 0x15d   : > { %v2422_v51 = vpack.c.bf16 %v2419_v50, %v2419_v50 }
 0x15f   : > { %2499 = vmatmul.bf16.vlgmr.msra.gmra.mxu0 %v2422_v51 }
 0x160   : > { %v2407_v53 = vpop.f32.mrf.mxu2 }
 0x161   : > { %v2535_v54 = vpop.f32.mrf.mxu1  ;;  %v2420_v55 = vpop.f32.mrf.mxu3 }
 0x162   : > { %v2536_v56 = vadd.f32 %v6237_v52, %v2535_v54 }
 0x164   : > { %v2539_v57 = vmax.f32 %v2536_v56, 0.0 }
 0x166   : > { %v2540_v58 = vpack.c.bf16 %v2539_v57, %v2539_v57 }
 0x168   : > { %5303 = vmatmul.msk.bf16.vlgmr.msra.gmra.mxu2 %vm2577_vm2, %v2540_v58 }
 0x169   : > { %v2537_v59 = vpop.f32.mrf.mxu1 }
 0x1dc   : > { %v2500_v62 = vpop.f32.mrf.mxu0 }
 0x1dd   : > { %v2501_v63 = vadd.f32 %v6238_v61, %v2500_v62 }
 0x1df   : > { %2505 = vst.msk [vmem:[#allocation2] sm:$0x3] %vm2504_vm3, %v2501_v63 }
 0x1e4   : > { %v2502_v0 = vpop.f32.mrf.mxu0 }
 0x1eb   : > { %v2590_v2 = vpop.f32.mrf.mxu2 }
 0x1ec   : > { %v2591_v3 = vadd.f32 %v6239_v1, %v2590_v2 }
 0x1ee   : > { %2594 = vst.msk [vmem:[#allocation3] sm:$0x3] %vm2504_vm3, %v2591_v3 }
 0x1f3   : > { %v2592_v4 = vpop.f32.mrf.mxu2 }
 0x1f4 PF: > { %v6088_v5 = vld [vmem:[%s6379_s25 + $0x18] sm:$0xff]  ;;  %v6087_v9 = vld [vmem:[%s6379_s25 + $0x10] sm:$0xff]  ;;  %v6086_v13 = vld [vmem:[%s6379_s25 + $0x8] sm:$0xff]  ;;  %vm2878_vm4 = vcmask 523264   ;;  %vm4075_vm5 = vcmask 517120   ;;  %vm4238_vm6 = vcmask 1041409  }
 0x1f5   : > { %v6092_v6 = vld [vmem:[%s6379_s25 + $0x38] sm:$0xff]  ;;  %2886 = vmatpush.bf16.msra.mxu0 %v6088_v5  ;;  %v6091_v10 = vld [vmem:[%s6379_s25 + $0x30] sm:$0xff]  ;;  %v6090_v14 = vld [vmem:[%s6379_s25 + $0x28] sm:$0xff]  ;;  %vm4240_vm7 = vcmask 1042434   ;;  %vm4242_vm8 = vcmask 1043459   ;;  %vm4244_vm9 = vcmask 1044484  }
 0x1f6   : > { %v6096_v7 = vld [vmem:[%s6379_s25 + $0x58] sm:$0xff]  ;;  %2923 = vmatpush.bf16.msra.mxu1 %v6092_v6  ;;  %v6095_v11 = vld [vmem:[%s6379_s25 + $0x50] sm:$0xff]  ;;  %v6094_v15 = vld [vmem:[%s6379_s25 + $0x48] sm:$0xff]  ;;  %vm4246_vm10 = vcmask 1045509   ;;  %vm4248_vm11 = vcmask 1046534   ;;  %vm4250_vm12 = vcmask 1047559  }
 0x1f7   : > { %v6100_v8 = vld [vmem:[%s6379_s25 + $0x78] sm:$0xff]  ;;  %2960 = vmatpush.bf16.msra.mxu2 %v6096_v7  ;;  %v6099_v12 = vld [vmem:[%s6379_s25 + $0x70] sm:$0xff]  ;;  %v6098_v16 = vld [vmem:[%s6379_s25 + $0x68] sm:$0xff]  ;;  %vm4327_vm13 = vcmask 261120   ;;  %p5857_p6 = scmp.ne.s32.totalorder %s6370_s19, 1 }
 0x1f8   : > { %2997 = vmatpush.bf16.msra.mxu3 %v6100_v8  ;;  %v6085_v17 = vld [vmem:[%s6379_s25] sm:$0xff]  ;;  %v2596_v19 = vld [vmem:[#allocation2] sm:$0x3]  ;;  %v6104_v22 = vld [vmem:[%s6379_s25 + $0x98] sm:$0xff] }
 0x1f9   : > { %2887 = vmatpush.bf16.msra.mxu0 %v6087_v9  ;;  %v6089_v18 = vld [vmem:[%s6379_s25 + $0x20] sm:$0xff]  ;;  %v6108_v23 = vld [vmem:[%s6379_s25 + $0xb8] sm:$0xff]  ;;  %v7059_v24 = vpack.c.bf16 %v2596_v19, %v2596_v19  ;;  %v6103_v27 = vld [vmem:[%s6379_s25 + $0x90] sm:$0xff] }
 0x1fa   : > { %2924 = vmatpush.bf16.msra.mxu1 %v6091_v10  ;;  %v6093_v20 = vld [vmem:[%s6379_s25 + $0x40] sm:$0xff]  ;;  %v6112_v25 = vld [vmem:[%s6379_s25 + $0xd8] sm:$0xff]  ;;  %v6107_v28 = vld [vmem:[%s6379_s25 + $0xb0] sm:$0xff] }
 0x1fb   : > { %2961 = vmatpush.bf16.msra.mxu2 %v6095_v11  ;;  %v6097_v21 = vld [vmem:[%s6379_s25 + $0x60] sm:$0xff]  ;;  %v6116_v26 = vld [vmem:[%s6379_s25 + $0xf8] sm:$0xff]  ;;  %v6111_v29 = vld [vmem:[%s6379_s25 + $0xd0] sm:$0xff] }
 0x1fc   : > { %2998 = vmatpush.bf16.msra.mxu3 %v6099_v12  ;;  %v6115_v30 = vld [vmem:[%s6379_s25 + $0xf0] sm:$0xff]  ;;  %v6102_v31 = vld [vmem:[%s6379_s25 + $0x88] sm:$0xff]  ;;  %v6101_v35 = vld [vmem:[%s6379_s25 + $0x80] sm:$0xff] }
 0x1fd   : > { %2888 = vmatpush.bf16.msra.mxu0 %v6086_v13  ;;  %v6106_v32 = vld [vmem:[%s6379_s25 + $0xa8] sm:$0xff]  ;;  %v6105_v36 = vld [vmem:[%s6379_s25 + $0xa0] sm:$0xff]  ;;  %v6120_v37 = vld [vmem:[%s6379_s25 + $0x118] sm:$0xff] }
 0x1fe   : > { %2925 = vmatpush.bf16.msra.mxu1 %v6090_v14  ;;  %v6110_v33 = vld [vmem:[%s6379_s25 + $0xc8] sm:$0xff]  ;;  %v6124_v38 = vld [vmem:[%s6379_s25 + $0x138] sm:$0xff]  ;;  %v6109_v39 = vld [vmem:[%s6379_s25 + $0xc0] sm:$0xff] }
 0x1ff   : > { %2962 = vmatpush.bf16.msra.mxu2 %v6094_v15  ;;  %v6114_v34 = vld [vmem:[%s6379_s25 + $0xe8] sm:$0xff]  ;;  %v6113_v40 = vld [vmem:[%s6379_s25 + $0xe0] sm:$0xff]  ;;  %v6128_v41 = vld [vmem:[%s6379_s25 + $0x158] sm:$0xff] }
 0x200   : > { %2999 = vmatpush.bf16.msra.mxu3 %v6098_v16  ;;  %v6132_v42 = vld [vmem:[%s6379_s25 + $0x178] sm:$0xff]  ;;  %v6119_v43 = vld [vmem:[%s6379_s25 + $0x110] sm:$0xff]  ;;  %v6118_v47 = vld [vmem:[%s6379_s25 + $0x108] sm:$0xff] }
 0x201   : > { %2889 = vmatpush.bf16.msra.mxu0 %v6085_v17  ;;  %v6123_v44 = vld [vmem:[%s6379_s25 + $0x130] sm:$0xff]  ;;  %v6122_v48 = vld [vmem:[%s6379_s25 + $0x128] sm:$0xff]  ;;  %v6117_v51 = vld [vmem:[%s6379_s25 + $0x100] sm:$0xff] }
 0x202   : > { %2926 = vmatpush.bf16.msra.mxu1 %v6089_v18  ;;  %v6127_v45 = vld [vmem:[%s6379_s25 + $0x150] sm:$0xff]  ;;  %v6126_v49 = vld [vmem:[%s6379_s25 + $0x148] sm:$0xff]  ;;  %v6121_v52 = vld [vmem:[%s6379_s25 + $0x120] sm:$0xff] }
 0x203   : > { %2963 = vmatpush.bf16.msra.mxu2 %v6093_v20  ;;  %v6131_v46 = vld [vmem:[%s6379_s25 + $0x170] sm:$0xff]  ;;  %v6130_v50 = vld [vmem:[%s6379_s25 + $0x168] sm:$0xff]  ;;  %v6125_v53 = vld [vmem:[%s6379_s25 + $0x140] sm:$0xff] }
 0x204   : > { %3000 = vmatpush.bf16.msra.mxu3 %v6097_v21  ;;  %5320 = vmatmul.msk.bf16.vlgmr.msra.gmra.mxu0 %vm2878_vm4, %v7059_v24  ;;  %v6129_v54 = vld [vmem:[%s6379_s25 + $0x160] sm:$0xff]  ;;  %v6136_v55 = vld [vmem:[%s6379_s25 + $0x198] sm:$0xff]  ;;  %v6135_v59 = vld [vmem:[%s6379_s25 + $0x190] sm:$0xff] }
 0x205   : > { %3034 = vmatpush.bf16.msrb.mxu0 %v6104_v22  ;;  %5337 = vmatmul.msk.bf16.vlgmr.msra.gmra.mxu1 %vm2878_vm4, %v7059_v24  ;;  %v6140_v56 = vld [vmem:[%s6379_s25 + $0x1b8] sm:$0xff]  ;;  %v6139_v60 = vld [vmem:[%s6379_s25 + $0x1b0] sm:$0xff]  ;;  %v6134_v63 = vld [vmem:[%s6379_s25 + $0x188] sm:$0xff] }
 0x206   : > { %3071 = vmatpush.bf16.msrb.mxu1 %v6108_v23  ;;  %5354 = vmatmul.msk.bf16.vlgmr.msra.gmra.mxu2 %vm2878_vm4, %v7059_v24  ;;  %v6144_v57 = vld [vmem:[%s6379_s25 + $0x1d8] sm:$0xff]  ;;  %v6143_v61 = vld [vmem:[%s6379_s25 + $0x1d0] sm:$0xff]  ;;  %v6138_v0 = vld [vmem:[%s6379_s25 + $0x1a8] sm:$0xff] }
 0x207   : > { %5371 = vmatmul.msk.bf16.vlgmr.msra.gmra.mxu3 %vm2878_vm4, %v7059_v24  ;;  %3108 = vmatpush.bf16.msrb.mxu2 %v6112_v25  ;;  %v6148_v58 = vld [vmem:[%s6379_s25 + $0x1f8] sm:$0xff]  ;;  %v6147_v62 = vld [vmem:[%s6379_s25 + $0x1f0] sm:$0xff]  ;;  %v6142_v1 = vld [vmem:[%s6379_s25 + $0x1c8] sm:$0xff] }
 0x208   : > { %3145 = vmatpush.bf16.msrb.mxu3 %v6116_v26  ;;  %v6146_v2 = vld [vmem:[%s6379_s25 + $0x1e8] sm:$0xff]  ;;  %v6133_v3 = vld [vmem:[%s6379_s25 + $0x180] sm:$0xff]  ;;  %v6152_v7 = vld [vmem:[%s6379_s25 + $0x218] sm:$0xff] }
 0x209   : > { %3035 = vmatpush.bf16.msrb.mxu0 %v6103_v27  ;;  %v6137_v4 = vld [vmem:[%s6379_s25 + $0x1a0] sm:$0xff]  ;;  %v6156_v8 = vld [vmem:[%s6379_s25 + $0x238] sm:$0xff]  ;;  %v6151_v11 = vld [vmem:[%s6379_s25 + $0x210] sm:$0xff] }
 0x20a   : > { %3072 = vmatpush.bf16.msrb.mxu1 %v6107_v28  ;;  %v6141_v5 = vld [vmem:[%s6379_s25 + $0x1c0] sm:$0xff]  ;;  %v6160_v9 = vld [vmem:[%s6379_s25 + $0x258] sm:$0xff]  ;;  %v6155_v12 = vld [vmem:[%s6379_s25 + $0x230] sm:$0xff] }
 0x20b   : > { %3109 = vmatpush.bf16.msrb.mxu2 %v6111_v29  ;;  %v6145_v6 = vld [vmem:[%s6379_s25 + $0x1e0] sm:$0xff]  ;;  %v6164_v10 = vld [vmem:[%s6379_s25 + $0x278] sm:$0xff]  ;;  %v6159_v13 = vld [vmem:[%s6379_s25 + $0x250] sm:$0xff] }
 0x20c   : > { %3146 = vmatpush.bf16.msrb.mxu3 %v6115_v30  ;;  %v6163_v14 = vld [vmem:[%s6379_s25 + $0x270] sm:$0xff]  ;;  %v6150_v15 = vld [vmem:[%s6379_s25 + $0x208] sm:$0xff]  ;;  %v6149_v19 = vld [vmem:[%s6379_s25 + $0x200] sm:$0xff] }
 0x20d   : > { %3036 = vmatpush.bf16.msrb.mxu0 %v6102_v31  ;;  %v6154_v16 = vld [vmem:[%s6379_s25 + $0x228] sm:$0xff]  ;;  %v6153_v20 = vld [vmem:[%s6379_s25 + $0x220] sm:$0xff]  ;;  %v6168_v23 = vld [vmem:[%s6379_s25 + $0x298] sm:$0xff] }
 0x20e   : > { %3073 = vmatpush.bf16.msrb.mxu1 %v6106_v32  ;;  %v6158_v17 = vld [vmem:[%s6379_s25 + $0x248] sm:$0xff]  ;;  %v6157_v21 = vld [vmem:[%s6379_s25 + $0x240] sm:$0xff]  ;;  %v6172_v25 = vld [vmem:[%s6379_s25 + $0x2b8] sm:$0xff] }
 0x20f   : > { %3110 = vmatpush.bf16.msrb.mxu2 %v6110_v33  ;;  %v6162_v18 = vld [vmem:[%s6379_s25 + $0x268] sm:$0xff]  ;;  %v6161_v22 = vld [vmem:[%s6379_s25 + $0x260] sm:$0xff]  ;;  %v6176_v26 = vld [vmem:[%s6379_s25 + $0x2d8] sm:$0xff] }
 0x210   : > { %3147 = vmatpush.bf16.msrb.mxu3 %v6114_v34  ;;  %v6180_v27 = vld [vmem:[%s6379_s25 + $0x2f8] sm:$0xff]  ;;  %v6167_v28 = vld [vmem:[%s6379_s25 + $0x290] sm:$0xff]  ;;  %v6166_v32 = vld [vmem:[%s6379_s25 + $0x288] sm:$0xff] }
 0x211   : > { %3037 = vmatpush.bf16.msrb.mxu0 %v6101_v35  ;;  %v6171_v29 = vld [vmem:[%s6379_s25 + $0x2b0] sm:$0xff]  ;;  %v6170_v33 = vld [vmem:[%s6379_s25 + $0x2a8] sm:$0xff] }
 0x212   : > { %3074 = vmatpush.bf16.msrb.mxu1 %v6105_v36  ;;  %v6175_v30 = vld [vmem:[%s6379_s25 + $0x2d0] sm:$0xff]  ;;  %v6174_v34 = vld [vmem:[%s6379_s25 + $0x2c8] sm:$0xff]  ;;  %v6165_v36 = vld [vmem:[%s6379_s25 + $0x280] sm:$0xff] }
 0x213   : > { %3111 = vmatpush.bf16.msrb.mxu2 %v6109_v39  ;;  %v6179_v31 = vld [vmem:[%s6379_s25 + $0x2f0] sm:$0xff]  ;;  %v6178_v35 = vld [vmem:[%s6379_s25 + $0x2e8] sm:$0xff]  ;;  %v6177_v39 = vld [vmem:[%s6379_s25 + $0x2e0] sm:$0xff] }
 0x214   : > { %3148 = vmatpush.bf16.msrb.mxu3 %v6113_v40  ;;  %5388 = vmatmul.msk.bf16.vlgmr.msrb.gmra.mxu0 %vm2878_vm4, %v7059_v24  ;;  %v6184_v40 = vld [vmem:[%s6379_s25 + $0x318] sm:$0xff] }
 0x215   : > { %3182 = vmatpush.bf16.msra.mxu0 %v6120_v37  ;;  %5405 = vmatmul.msk.bf16.vlgmr.msrb.gmra.mxu1 %vm2878_vm4, %v7059_v24  ;;  %v6169_v37 = vld [vmem:[%s6379_s25 + $0x2a0] sm:$0xff] }
 0x216   : > { %3219 = vmatpush.bf16.msra.mxu1 %v6124_v38  ;;  %5422 = vmatmul.msk.bf16.vlgmr.msrb.gmra.mxu2 %vm2878_vm4, %v7059_v24  ;;  %v6173_v38 = vld [vmem:[%s6379_s25 + $0x2c0] sm:$0xff] }
 0x217   : > { %3256 = vmatpush.bf16.msra.mxu2 %v6128_v41  ;;  %5439 = vmatmul.msk.bf16.vlgmr.msrb.gmra.mxu3 %vm2878_vm4, %v7059_v24  ;;  %v6188_v41 = vld [vmem:[%s6379_s25 + $0x338] sm:$0xff] }
 0x218   : > { %3293 = vmatpush.bf16.msra.mxu3 %v6132_v42  ;;  %v6192_v42 = vld [vmem:[%s6379_s25 + $0x358] sm:$0xff] }
 0x219   : > { %3183 = vmatpush.bf16.msra.mxu0 %v6119_v43  ;;  %v6196_v43 = vld [vmem:[%s6379_s25 + $0x378] sm:$0xff] }
 0x21a   : > { %3220 = vmatpush.bf16.msra.mxu1 %v6123_v44  ;;  %v6183_v44 = vld [vmem:[%s6379_s25 + $0x310] sm:$0xff] }
 0x21b   : > { %3257 = vmatpush.bf16.msra.mxu2 %v6127_v45  ;;  %v6187_v45 = vld [vmem:[%s6379_s25 + $0x330] sm:$0xff] }
 0x21c   : > { %3294 = vmatpush.bf16.msra.mxu3 %v6131_v46  ;;  %v6191_v46 = vld [vmem:[%s6379_s25 + $0x350] sm:$0xff] }
 0x21d   : > { %3184 = vmatpush.bf16.msra.mxu0 %v6118_v47  ;;  %v6195_v47 = vld [vmem:[%s6379_s25 + $0x370] sm:$0xff] }
 0x21e   : > { %3221 = vmatpush.bf16.msra.mxu1 %v6122_v48  ;;  %v6182_v48 = vld [vmem:[%s6379_s25 + $0x308] sm:$0xff] }
 0x21f   : > { %3258 = vmatpush.bf16.msra.mxu2 %v6126_v49  ;;  %v6186_v49 = vld [vmem:[%s6379_s25 + $0x328] sm:$0xff] }
 0x220   : > { %3295 = vmatpush.bf16.msra.mxu3 %v6130_v50  ;;  %v6190_v50 = vld [vmem:[%s6379_s25 + $0x348] sm:$0xff] }
 0x221   : > { %3185 = vmatpush.bf16.msra.mxu0 %v6117_v51  ;;  %v6194_v51 = vld [vmem:[%s6379_s25 + $0x368] sm:$0xff] }
 0x222   : > { %3222 = vmatpush.bf16.msra.mxu1 %v6121_v52  ;;  %v6181_v52 = vld [vmem:[%s6379_s25 + $0x300] sm:$0xff] }
 0x223   : > { %3259 = vmatpush.bf16.msra.mxu2 %v6125_v53  ;;  %v6185_v53 = vld [vmem:[%s6379_s25 + $0x320] sm:$0xff] }
 0x224   : > { %3296 = vmatpush.bf16.msra.mxu3 %v6129_v54  ;;  %5456 = vmatmul.msk.bf16.vlgmr.msra.gmra.mxu0 %vm2878_vm4, %v7059_v24  ;;  %v6189_v54 = vld [vmem:[%s6379_s25 + $0x340] sm:$0xff] }
 0x225   : > { %3330 = vmatpush.bf16.msrb.mxu0 %v6136_v55  ;;  %5473 = vmatmul.msk.bf16.vlgmr.msra.gmra.mxu1 %vm2878_vm4, %v7059_v24  ;;  %v6193_v55 = vld [vmem:[%s6379_s25 + $0x360] sm:$0xff] }
 0x226   : > { %3367 = vmatpush.bf16.msrb.mxu1 %v6140_v56  ;;  %5490 = vmatmul.msk.bf16.vlgmr.msra.gmra.mxu2 %vm2878_vm4, %v7059_v24  ;;  %v6200_v56 = vld [vmem:[%s6379_s25 + $0x398] sm:$0xff] }
 0x227   : > { %3404 = vmatpush.bf16.msrb.mxu2 %v6144_v57  ;;  %5507 = vmatmul.msk.bf16.vlgmr.msra.gmra.mxu3 %vm2878_vm4, %v7059_v24  ;;  %v6204_v57 = vld [vmem:[%s6379_s25 + $0x3b8] sm:$0xff] }
 0x228   : > { %3441 = vmatpush.bf16.msrb.mxu3 %v6148_v58  ;;  %v6208_v58 = vld [vmem:[%s6379_s25 + $0x3d8] sm:$0xff] }
 0x229   : > { %3331 = vmatpush.bf16.msrb.mxu0 %v6135_v59  ;;  %v6212_v59 = vld [vmem:[%s6379_s25 + $0x3f8] sm:$0xff] }
 0x22a   : > { %3368 = vmatpush.bf16.msrb.mxu1 %v6139_v60  ;;  %v6199_v60 = vld [vmem:[%s6379_s25 + $0x390] sm:$0xff] }
 0x22b   : > { %3405 = vmatpush.bf16.msrb.mxu2 %v6143_v61  ;;  %v6203_v61 = vld [vmem:[%s6379_s25 + $0x3b0] sm:$0xff] }
 0x22c   : > { %3442 = vmatpush.bf16.msrb.mxu3 %v6147_v62  ;;  %v6207_v62 = vld [vmem:[%s6379_s25 + $0x3d0] sm:$0xff] }
 0x22d   : > { %3332 = vmatpush.bf16.msrb.mxu0 %v6134_v63  ;;  %v6211_v63 = vld [vmem:[%s6379_s25 + $0x3f0] sm:$0xff] }
 0x22e   : > { %3369 = vmatpush.bf16.msrb.mxu1 %v6138_v0  ;;  %v6198_v0 = vld [vmem:[%s6379_s25 + $0x388] sm:$0xff] }
 0x22f   : > { %3406 = vmatpush.bf16.msrb.mxu2 %v6142_v1  ;;  %v6202_v1 = vld [vmem:[%s6379_s25 + $0x3a8] sm:$0xff] }
 0x230   : > { %3443 = vmatpush.bf16.msrb.mxu3 %v6146_v2  ;;  %v6206_v2 = vld [vmem:[%s6379_s25 + $0x3c8] sm:$0xff] }
 0x231   : > { %3333 = vmatpush.bf16.msrb.mxu0 %v6133_v3  ;;  %v6210_v3 = vld [vmem:[%s6379_s25 + $0x3e8] sm:$0xff] }
 0x232   : > { %3370 = vmatpush.bf16.msrb.mxu1 %v6137_v4  ;;  %v6197_v4 = vld [vmem:[%s6379_s25 + $0x380] sm:$0xff] }
 0x233   : > { %3407 = vmatpush.bf16.msrb.mxu2 %v6141_v5  ;;  %v6201_v5 = vld [vmem:[%s6379_s25 + $0x3a0] sm:$0xff] }
 0x234   : > { %3444 = vmatpush.bf16.msrb.mxu3 %v6145_v6  ;;  %5524 = vmatmul.msk.bf16.vlgmr.msrb.gmra.mxu0 %vm2878_vm4, %v7059_v24  ;;  %v6205_v6 = vld [vmem:[%s6379_s25 + $0x3c0] sm:$0xff] }
 0x235   : > { %3478 = vmatpush.bf16.msra.mxu0 %v6152_v7  ;;  %5541 = vmatmul.msk.bf16.vlgmr.msrb.gmra.mxu1 %vm2878_vm4, %v7059_v24  ;;  %v6209_v7 = vld [vmem:[%s6379_s25 + $0x3e0] sm:$0xff] }
 0x236   : > { %3515 = vmatpush.bf16.msra.mxu1 %v6156_v8  ;;  %5558 = vmatmul.msk.bf16.vlgmr.msrb.gmra.mxu2 %vm2878_vm4, %v7059_v24  ;;  %v7235_v8 = vld [vmem:[#allocation3] sm:$0x3] }
 0x237   : > { %3552 = vmatpush.bf16.msra.mxu2 %v6160_v9  ;;  %5575 = vmatmul.msk.bf16.vlgmr.msrb.gmra.mxu3 %vm2878_vm4, %v7059_v24 }
 0x238   : > { %3589 = vmatpush.bf16.msra.mxu3 %v6164_v10 }
 0x239   : > { %3479 = vmatpush.bf16.msra.mxu0 %v6151_v11 }
 0x23a   : > { %3516 = vmatpush.bf16.msra.mxu1 %v6155_v12 }
 0x23b   : > { %3553 = vmatpush.bf16.msra.mxu2 %v6159_v13 }
 0x23c   : > { %3590 = vmatpush.bf16.msra.mxu3 %v6163_v14 }
 0x23d   : > { %3480 = vmatpush.bf16.msra.mxu0 %v6150_v15 }
 0x23e   : > { %3517 = vmatpush.bf16.msra.mxu1 %v6154_v16 }
 0x23f   : > { %3554 = vmatpush.bf16.msra.mxu2 %v6158_v17 }
 0x240   : > { %3591 = vmatpush.bf16.msra.mxu3 %v6162_v18 }
 0x241   : > { %3481 = vmatpush.bf16.msra.mxu0 %v6149_v19 }
 0x242   : > { %3518 = vmatpush.bf16.msra.mxu1 %v6153_v20 }
 0x243   : > { %3555 = vmatpush.bf16.msra.mxu2 %v6157_v21 }
 0x244   : > { %3592 = vmatpush.bf16.msra.mxu3 %v6161_v22  ;;  %5592 = vmatmul.msk.bf16.vlgmr.msra.gmra.mxu0 %vm2878_vm4, %v7059_v24 }
 0x245   : > { %3626 = vmatpush.bf16.msrb.mxu0 %v6168_v23  ;;  %5609 = vmatmul.msk.bf16.vlgmr.msra.gmra.mxu1 %vm2878_vm4, %v7059_v24 }
 0x246   : > { %3663 = vmatpush.bf16.msrb.mxu1 %v6172_v25  ;;  %5626 = vmatmul.msk.bf16.vlgmr.msra.gmra.mxu2 %vm2878_vm4, %v7059_v24 }
 0x247   : > { %3700 = vmatpush.bf16.msrb.mxu2 %v6176_v26  ;;  %5643 = vmatmul.msk.bf16.vlgmr.msra.gmra.mxu3 %vm2878_vm4, %v7059_v24 }
 0x248   : > { %3737 = vmatpush.bf16.msrb.mxu3 %v6180_v27 }
 0x249   : > { %3627 = vmatpush.bf16.msrb.mxu0 %v6167_v28 }
 0x24a   : > { %3664 = vmatpush.bf16.msrb.mxu1 %v6171_v29 }
 0x24b   : > { %3701 = vmatpush.bf16.msrb.mxu2 %v6175_v30 }
 0x24c   : > { %3738 = vmatpush.bf16.msrb.mxu3 %v6179_v31 }
 0x24d   : > { %3628 = vmatpush.bf16.msrb.mxu0 %v6166_v32 }
 0x24e   : > { %3665 = vmatpush.bf16.msrb.mxu1 %v6170_v33 }
 0x24f   : > { %3702 = vmatpush.bf16.msrb.mxu2 %v6174_v34 }
 0x250   : > { %3739 = vmatpush.bf16.msrb.mxu3 %v6178_v35 }
 0x251   : > { %3629 = vmatpush.bf16.msrb.mxu0 %v6165_v36 }
 0x252   : > { %3666 = vmatpush.bf16.msrb.mxu1 %v6169_v37 }
 0x253   : > { %3703 = vmatpush.bf16.msrb.mxu2 %v6173_v38 }
 0x254   : > { %3740 = vmatpush.bf16.msrb.mxu3 %v6177_v39  ;;  %5660 = vmatmul.msk.bf16.vlgmr.msrb.gmra.mxu0 %vm2878_vm4, %v7059_v24 }
 0x255   : > { %3774 = vmatpush.bf16.msra.mxu0 %v6184_v40  ;;  %5677 = vmatmul.msk.bf16.vlgmr.msrb.gmra.mxu1 %vm2878_vm4, %v7059_v24 }
 0x256   : > { %3811 = vmatpush.bf16.msra.mxu1 %v6188_v41  ;;  %5694 = vmatmul.msk.bf16.vlgmr.msrb.gmra.mxu2 %vm2878_vm4, %v7059_v24 }
 0x257   : > { %3848 = vmatpush.bf16.msra.mxu2 %v6192_v42  ;;  %5711 = vmatmul.msk.bf16.vlgmr.msrb.gmra.mxu3 %vm2878_vm4, %v7059_v24 }
 0x258   : > { %3885 = vmatpush.bf16.msra.mxu3 %v6196_v43 }
 0x259   : > { %3775 = vmatpush.bf16.msra.mxu0 %v6183_v44 }
 0x25a   : > { %3812 = vmatpush.bf16.msra.mxu1 %v6187_v45 }
 0x25b   : > { %3849 = vmatpush.bf16.msra.mxu2 %v6191_v46 }
 0x25c   : > { %3886 = vmatpush.bf16.msra.mxu3 %v6195_v47 }
 0x25d   : > { %3776 = vmatpush.bf16.msra.mxu0 %v6182_v48 }
 0x25e   : > { %3813 = vmatpush.bf16.msra.mxu1 %v6186_v49 }
 0x25f   : > { %3850 = vmatpush.bf16.msra.mxu2 %v6190_v50 }
 0x260   : > { %3887 = vmatpush.bf16.msra.mxu3 %v6194_v51 }
 0x261   : > { %3777 = vmatpush.bf16.msra.mxu0 %v6181_v52 }
 0x262   : > { %3814 = vmatpush.bf16.msra.mxu1 %v6185_v53 }
 0x263   : > { %3851 = vmatpush.bf16.msra.mxu2 %v6189_v54 }
 0x264   : > { %3888 = vmatpush.bf16.msra.mxu3 %v6193_v55  ;;  %5728 = vmatmul.msk.bf16.vlgmr.msra.gmra.mxu0 %vm2878_vm4, %v7059_v24 }
 0x265   : > { %3922 = vmatpush.bf16.msrb.mxu0 %v6200_v56  ;;  %5745 = vmatmul.msk.bf16.vlgmr.msra.gmra.mxu1 %vm2878_vm4, %v7059_v24 }
 0x266   : > { %3959 = vmatpush.bf16.msrb.mxu1 %v6204_v57  ;;  %5762 = vmatmul.msk.bf16.vlgmr.msra.gmra.mxu2 %vm2878_vm4, %v7059_v24 }
 0x267   : > { %3996 = vmatpush.bf16.msrb.mxu2 %v6208_v58  ;;  %5779 = vmatmul.msk.bf16.vlgmr.msra.gmra.mxu3 %vm2878_vm4, %v7059_v24 }
 0x268   : > { %4033 = vmatpush.bf16.msrb.mxu3 %v6212_v59 }
 0x269   : > { %3923 = vmatpush.bf16.msrb.mxu0 %v6199_v60 }
 0x26a   : > { %3960 = vmatpush.bf16.msrb.mxu1 %v6203_v61 }
 0x26b   : > { %3997 = vmatpush.bf16.msrb.mxu2 %v6207_v62 }
 0x26c   : > { %4034 = vmatpush.bf16.msrb.mxu3 %v6211_v63 }
 0x26d   : > { %3924 = vmatpush.bf16.msrb.mxu0 %v6198_v0 }
 0x26e   : > { %3961 = vmatpush.bf16.msrb.mxu1 %v6202_v1 }
 0x26f   : > { %3998 = vmatpush.bf16.msrb.mxu2 %v6206_v2 }
 0x270   : > { %4035 = vmatpush.bf16.msrb.mxu3 %v6210_v3 }
 0x271   : > { %3925 = vmatpush.bf16.msrb.mxu0 %v6197_v4 }
 0x272   : > { %3962 = vmatpush.bf16.msrb.mxu1 %v6201_v5 }
 0x273   : > { %3999 = vmatpush.bf16.msrb.mxu2 %v6205_v6 }
 0x274   : > { %4036 = vmatpush.bf16.msrb.mxu3 %v6209_v7  ;;  %5796 = vmatmul.msk.bf16.vlgmr.msrb.gmra.mxu0 %vm2878_vm4, %v7059_v24 }
 0x275   : > { %5813 = vmatmul.msk.bf16.vlgmr.msrb.gmra.mxu1 %vm2878_vm4, %v7059_v24 }
 0x276   : > { %5830 = vmatmul.msk.bf16.vlgmr.msrb.gmra.mxu2 %vm2878_vm4, %v7059_v24 }
 0x277   : > { %5847 = vmatmul.msk.bf16.vlgmr.msrb.gmra.mxu3 %vm2878_vm4, %v7059_v24 }
 0x281   : > { %v2891_v9 = vpop.f32.mrf.mxu0 }
 0x282   : > { %v2928_v10 = vpop.f32.mrf.mxu1  ;;  %v4043_v11 = vmul.f32 %v7235_v8, %v2891_v9 }
 0x283   : > { %v4044_v13 = vmul.f32 %v7235_v8, %v2928_v10 }
 0x284   : > { %v4076_v12 = vsel %vm4075_vm5, %v4043_v11, 0.0 }
 0x285   : > { %4077 = vadd.xlane.f32.xlu0 %v4076_v12  ;;  %v4079_v19 = vsel %vm4075_vm5, %v4044_v13, 0.0 }
 0x289   : > { %v2965_v14 = vpop.f32.mrf.mxu2  ;;  %v2893_v17 = vpop.f32.mrf.mxu0 }
 0x28a   : > { %v3002_v15 = vpop.f32.mrf.mxu3  ;;  %v4045_v16 = vmul.f32 %v7235_v8, %v2965_v14  ;;  %v2930_v18 = vpop.f32.mrf.mxu1 }
 0x28b   : > { %v4046_v20 = vmul.f32 %v7235_v8, %v3002_v15 }
 0x28c   : > { %v4082_v24 = vsel %vm4075_vm5, %v4045_v16, 0.0 }
 0x28d   : > { %4083 = vadd.xlane.f32.xlu1 %v4082_v24  ;;  %4080 = vadd.xlane.f32.xlu0 %v4079_v19  ;;  %v4085_v27 = vsel %vm4075_vm5, %v4046_v20, 0.0 }
 0x291   : > { %v2967_v21 = vpop.f32.mrf.mxu2  ;;  %v3039_v23 = vpop.f32.mrf.mxu0 }
 0x292   : > { %v3004_v22 = vpop.f32.mrf.mxu3  ;;  %v3076_v25 = vpop.f32.mrf.mxu1  ;;  %v4047_v26 = vmul.f32 %v7235_v8, %v3039_v23 }
 0x293   : > { %v4048_v29 = vmul.f32 %v7235_v8, %v3076_v25 }
 0x294   : > { %v4088_v28 = vsel %vm4075_vm5, %v4047_v26, 0.0 }
 0x295   : > { %4086 = vadd.xlane.f32.xlu1 %v4085_v27  ;;  %4089 = vadd.xlane.f32.xlu2 %v4088_v28  ;;  %v4091_v36 = vsel %vm4075_vm5, %v4048_v29, 0.0 }
 0x299   : > { %v3113_v30 = vpop.f32.mrf.mxu2  ;;  %v3041_v34 = vpop.f32.mrf.mxu0 }
 0x29a   : > { %v3150_v31 = vpop.f32.mrf.mxu3  ;;  %v4049_v32 = vmul.f32 %v7235_v8, %v3113_v30  ;;  %v3078_v35 = vpop.f32.mrf.mxu1 }
 0x29b   : > { %v4050_v33 = vmul.f32 %v7235_v8, %v3150_v31 }
 0x29c   : > { %v4094_v37 = vsel %vm4075_vm5, %v4049_v32, 0.0 }
 0x29d   : > { %v4097_v38 = vsel %vm4075_vm5, %v4050_v33, 0.0  ;;  %4092 = vadd.xlane.f32.xlu1 %v4091_v36  ;;  %4095 = vadd.xlane.f32.xlu0 %v4094_v37 }
 0x29e   : > { %4098 = vadd.xlane.f32.xlu2 %v4097_v38 }
 0x2a1   : > { %v3115_v39 = vpop.f32.mrf.mxu2  ;;  %v3187_v41 = vpop.f32.mrf.mxu0 }
 0x2a2   : > { %v3152_v40 = vpop.f32.mrf.mxu3  ;;  %v3224_v42 = vpop.f32.mrf.mxu1  ;;  %v4051_v43 = vmul.f32 %v7235_v8, %v3187_v41 }
 0x2a3   : > { %v4052_v44 = vmul.f32 %v7235_v8, %v3224_v42 }
 0x2a4   : > { %v4100_v46 = vsel %vm4075_vm5, %v4051_v43, 0.0 }
 0x2a5   : > { %v4103_v45 = vsel %vm4075_vm5, %v4052_v44, 0.0 }
 0x2a6   : > { %4104 = vadd.xlane.f32.xlu0 %v4103_v45  ;;  %4101 = vadd.xlane.f32.xlu2 %v4100_v46 }
 0x2a9   : > { %v3261_v47 = vpop.f32.mrf.mxu2  ;;  %v3189_v51 = vpop.f32.mrf.mxu0 }
 0x2aa   : > { %v3298_v48 = vpop.f32.mrf.mxu3  ;;  %v4053_v49 = vmul.f32 %v7235_v8, %v3261_v47  ;;  %v3226_v52 = vpop.f32.mrf.mxu1 }
 0x2ab   : > { %v4054_v50 = vmul.f32 %v7235_v8, %v3298_v48 }
 0x2ac   : > { %v4106_v54 = vsel %vm4075_vm5, %v4053_v49, 0.0 }
 0x2ad   : > { %v4109_v53 = vsel %vm4075_vm5, %v4054_v50, 0.0 }
 0x2ae   : > { %4110 = vadd.xlane.f32.xlu1 %v4109_v53  ;;  %4107 = vadd.xlane.f32.xlu2 %v4106_v54 }
 0x2b1   : > { %v3263_v55 = vpop.f32.mrf.mxu2  ;;  %v3335_v57 = vpop.f32.mrf.mxu0 }
 0x2b2   : > { %v3300_v56 = vpop.f32.mrf.mxu3  ;;  %v3372_v58 = vpop.f32.mrf.mxu1  ;;  %v4055_v59 = vmul.f32 %v7235_v8, %v3335_v57 }
 0x2b3   : > { %v4056_v61 = vmul.f32 %v7235_v8, %v3372_v58 }
 0x2b4   : > { %v4112_v60 = vsel %vm4075_vm5, %v4055_v59, 0.0 }
 0x2b5   : > { %4113 = vadd.xlane.f32.xlu0 %v4112_v60  ;;  %v4115_v6 = vsel %vm4075_vm5, %v4056_v61, 0.0 }
 0x2b9   : > { %v3409_v62 = vpop.f32.mrf.mxu2  ;;  %v3337_v2 = vpop.f32.mrf.mxu0 }
 0x2ba   : > { %v3446_v63 = vpop.f32.mrf.mxu3  ;;  %v4057_v0 = vmul.f32 %v7235_v8, %v3409_v62  ;;  %v3374_v3 = vpop.f32.mrf.mxu1 }
 0x2bb   : > { %v4058_v1 = vmul.f32 %v7235_v8, %v3446_v63 }
 0x2bc   : > { %v4118_v4 = vsel %vm4075_vm5, %v4057_v0, 0.0 }
 0x2bd   : > { %v4121_v5 = vsel %vm4075_vm5, %v4058_v1, 0.0  ;;  %4119 = vadd.xlane.f32.xlu2 %v4118_v4  ;;  %4116 = vadd.xlane.f32.xlu0 %v4115_v6 }
 0x2be   : > { %4122 = vadd.xlane.f32.xlu1 %v4121_v5 }
 0x2c1   : > { %v3411_v7 = vpop.f32.mrf.mxu2  ;;  %v3483_v10 = vpop.f32.mrf.mxu0 }
 0x2c2   : > { %v3448_v9 = vpop.f32.mrf.mxu3  ;;  %v3520_v11 = vpop.f32.mrf.mxu1  ;;  %v4059_v12 = vmul.f32 %v7235_v8, %v3483_v10 }
 0x2c3   : > { %v4060_v13 = vmul.f32 %v7235_v8, %v3520_v11 }
 0x2c4   : > { %v4124_v15 = vsel %vm4075_vm5, %v4059_v12, 0.0 }
 0x2c5   : > { %v4127_v14 = vsel %vm4075_vm5, %v4060_v13, 0.0  ;;  %v4204_v13 = vlaneseq }
 0x2c6   : > { %4128 = vadd.xlane.f32.xlu2 %v4127_v14  ;;  %4125 = vadd.xlane.f32.xlu1 %v4124_v15 }
 0x2c9   : > { %v3557_v16 = vpop.f32.mrf.mxu2  ;;  %v3485_v19 = vpop.f32.mrf.mxu0 }
 0x2ca   : > { %v3594_v17 = vpop.f32.mrf.mxu3  ;;  %v4061_v18 = vmul.f32 %v7235_v8, %v3557_v16  ;;  %v3522_v20 = vpop.f32.mrf.mxu1  ;;  %v7301_v16 = vand.u32 127, %v4204_v13 }
 0x2cb   : > { %v4062_v24 = vmul.f32 %v7235_v8, %v3594_v17 }
 0x2cc   : > { %v4130_v22 = vsel %vm4075_vm5, %v4061_v18, 0.0 }
 0x2cd   : > { %v4133_v21 = vsel %vm4075_vm5, %v4062_v24, 0.0 }
 0x2ce   : > { %4134 = vadd.xlane.f32.xlu0 %v4133_v21  ;;  %4131 = vadd.xlane.f32.xlu1 %v4130_v22 }
 0x2d1   : > { %v3559_v23 = vpop.f32.mrf.mxu2  ;;  %v3631_v26 = vpop.f32.mrf.mxu0 }
 0x2d2   : > { %v3596_v25 = vpop.f32.mrf.mxu3  ;;  %v3668_v27 = vpop.f32.mrf.mxu1  ;;  %v4063_v28 = vmul.f32 %v7235_v8, %v3631_v26 }
 0x2d3   : > { %v4064_v30 = vmul.f32 %v7235_v8, %v3668_v27 }
 0x2d4   : > { %v4136_v29 = vsel %vm4075_vm5, %v4063_v28, 0.0 }
 0x2d5   : > { %4137 = vadd.xlane.f32.xlu2 %v4136_v29  ;;  %v4139_v39 = vsel %vm4075_vm5, %v4064_v30, 0.0 }
 0x2d9   : > { %v3705_v31 = vpop.f32.mrf.mxu2  ;;  %v3633_v35 = vpop.f32.mrf.mxu0 }
 0x2da   : > { %v3742_v32 = vpop.f32.mrf.mxu3  ;;  %v4065_v33 = vmul.f32 %v7235_v8, %v3705_v31  ;;  %v3670_v36 = vpop.f32.mrf.mxu1 }
 0x2db   : > { %v4066_v34 = vmul.f32 %v7235_v8, %v3742_v32 }
 0x2dc   : > { %v4142_v37 = vsel %vm4075_vm5, %v4065_v33, 0.0 }
 0x2dd   : > { %v4145_v38 = vsel %vm4075_vm5, %v4066_v34, 0.0  ;;  %4143 = vadd.xlane.f32.xlu1 %v4142_v37  ;;  %4140 = vadd.xlane.f32.xlu2 %v4139_v39 }
 0x2de   : > { %4146 = vadd.xlane.f32.xlu0 %v4145_v38 }
 0x2e1   : > { %v3707_v40 = vpop.f32.mrf.mxu2  ;;  %v3779_v42 = vpop.f32.mrf.mxu0 }
 0x2e2   : > { %v3744_v41 = vpop.f32.mrf.mxu3  ;;  %v3816_v43 = vpop.f32.mrf.mxu1  ;;  %v4067_v44 = vmul.f32 %v7235_v8, %v3779_v42 }
 0x2e3   : > { %v4068_v45 = vmul.f32 %v7235_v8, %v3816_v43 }
 0x2e4   : > { %v4148_v47 = vsel %vm4075_vm5, %v4067_v44, 0.0 }
 0x2e5   : > { %v4151_v46 = vsel %vm4075_vm5, %v4068_v45, 0.0 }
 0x2e6   : > { %4152 = vadd.xlane.f32.xlu1 %v4151_v46  ;;  %4149 = vadd.xlane.f32.xlu0 %v4148_v47 }
 0x2e9   : > { %v3853_v48 = vpop.f32.mrf.mxu2  ;;  %v3781_v52 = vpop.f32.mrf.mxu0 }
 0x2ea   : > { %v3890_v49 = vpop.f32.mrf.mxu3  ;;  %v4069_v50 = vmul.f32 %v7235_v8, %v3853_v48  ;;  %v3818_v53 = vpop.f32.mrf.mxu1 }
 0x2eb   : > { %v4070_v51 = vmul.f32 %v7235_v8, %v3890_v49 }
 0x2ec   : > { %v4154_v55 = vsel %vm4075_vm5, %v4069_v50, 0.0 }
 0x2ed   : > { %v4157_v54 = vsel %vm4075_vm5, %v4070_v51, 0.0 }
 0x2ee   : > { %4158 = vadd.xlane.f32.xlu2 %v4157_v54  ;;  %4155 = vadd.xlane.f32.xlu0 %v4154_v55 }
 0x2f1   : > { %v3855_v56 = vpop.f32.mrf.mxu2  ;;  %v3927_v58 = vpop.f32.mrf.mxu0 }
 0x2f2   : > { %v3892_v57 = vpop.f32.mrf.mxu3  ;;  %v3964_v59 = vpop.f32.mrf.mxu1  ;;  %v4071_v60 = vmul.f32 %v7235_v8, %v3927_v58 }
 0x2f3   : > { %v4072_v61 = vmul.f32 %v7235_v8, %v3964_v59 }
 0x2f4   : > { %v4160_v63 = vsel %vm4075_vm5, %v4071_v60, 0.0 }
 0x2f5   : > { %v4163_v62 = vsel %vm4075_vm5, %v4072_v61, 0.0  ;;  %4161 = vadd.xlane.f32.xlu1 %v4160_v63 }
 0x2f6   : > { %4164 = vadd.xlane.f32.xlu2 %v4163_v62 }
 0x2f8   : > { %v4078_v9 = vpop.xlane.xlu0 %4077 }
 0x2f9   : > { %v4001_v0 = vpop.f32.mrf.mxu2  ;;  %v3929_v4 = vpop.f32.mrf.mxu0  ;;  %v4206_v18 = vperm.slane %v4078_v9, %v7301_v16 }
 0x2fa   : > { %v4038_v1 = vpop.f32.mrf.mxu3  ;;  %v4073_v2 = vmul.f32 %v7235_v8, %v4001_v0  ;;  %v3966_v5 = vpop.f32.mrf.mxu1 }
 0x2fb   : > { %v4074_v3 = vmul.f32 %v7235_v8, %v4038_v1 }
 0x2fc   : > { %v4166_v6 = vsel %vm4075_vm5, %v4073_v2, 0.0 }
 0x2fd   : > { %v4169_v7 = vsel %vm4075_vm5, %v4074_v3, 0.0  ;;  %4167 = vadd.xlane.f32.xlu0 %v4166_v6 }
 0x2fe   : > { %4170 = vadd.xlane.f32.xlu1 %v4169_v7 }
 0x300   : > { %v4084_v10 = vpop.xlane.xlu1 %4083  ;;  %v4081_v15 = vpop.xlane.xlu0 %4080 }
 0x301   : > { %v4003_v11 = vpop.f32.mrf.mxu2  ;;  %v4207_v8 = vperm.slane %v4081_v15, %v7301_v16  ;;  %v4208_v20 = vperm.slane %v4084_v10, %v7301_v16 }
 0x302   : > { %v4040_v12 = vpop.f32.mrf.mxu3 }
 0x303   : > { %v4239_v24 = vsel %vm4238_vm6, %v4207_v8, %v4206_v18  ;;  %v6214_v8 = vld [vmem:[%s6384_s29 + $0x8] sm:$0xff] }
 0x304   : > { %v4241_v22 = vsel %vm4240_vm7, %v4208_v20, %v4239_v24  ;;  %4337 = vmatpush.bf16.msra.mxu0 %v6214_v8  ;;  %v6213_v24 = vld [vmem:[%s6384_s29] sm:$0xff] }
 0x308   : > { %v4087_v14 = vpop.xlane.xlu1 %4086  ;;  %v4090_v17 = vpop.xlane.xlu2 %4089  ;;  %4338 = vmatpush.bf16.msra.mxu0 %v6213_v24 }
 0x309   : > { %v4209_v19 = vperm.slane %v4087_v14, %v7301_v16  ;;  %v4210_v23 = vperm.slane %v4090_v17, %v7301_v16 }
 0x30b   : > { %v4243_v25 = vsel %vm4242_vm8, %v4209_v19, %v4241_v22 }
 0x30c   : > { %v4245_v29 = vsel %vm4244_vm9, %v4210_v23, %v4243_v25 }
 0x310   : > { %v4093_v21 = vpop.xlane.xlu1 %4092  ;;  %v4096_v27 = vpop.xlane.xlu0 %4095 }
 0x311   : > { %v4211_v26 = vperm.slane %v4093_v21, %v7301_v16  ;;  %v4099_v28 = vpop.xlane.xlu2 %4098  ;;  %v4212_v30 = vperm.slane %v4096_v27, %v7301_v16 }
 0x312   : > { %v4213_v32 = vperm.slane %v4099_v28, %v7301_v16 }
 0x313   : > { %v4247_v31 = vsel %vm4246_vm10, %v4211_v26, %v4245_v29 }
 0x314   : > { %v4249_v33 = vsel %vm4248_vm11, %v4212_v30, %v4247_v31 }
 0x315   : > { %v4251_v35 = vsel %vm4250_vm12, %v4213_v32, %v4249_v33 }
 0x319   : > { %v4102_v34 = vpop.xlane.xlu2 %4101  ;;  %v4105_v36 = vpop.xlane.xlu0 %4104 }
 0x31a   : > { %v4215_v40 = vperm.slane %v4105_v36, %v7301_v16  ;;  %v4214_v41 = vperm.slane %v4102_v34, %v7301_v16 }
 0x31c   : > { %v4252_v43 = vsel %vm4238_vm6, %v4215_v40, %v4214_v41 }
 0x31f   : > { %4277 = vxpose.xlu2.b32.start [1/4] (short) (narrow) %v4251_v35, 8 }
 0x321   : > { %v4108_v37 = vpop.xlane.xlu2 %4107  ;;  %v4111_v38 = vpop.xlane.xlu1 %4110 }
 0x322   : > { %v4216_v42 = vperm.slane %v4108_v37, %v7301_v16  ;;  %v4217_v44 = vperm.slane %v4111_v38, %v7301_v16 }
 0x324   : > { %v4253_v45 = vsel %vm4240_vm7, %v4216_v42, %v4252_v43 }
 0x325   : > { %v4254_v50 = vsel %vm4242_vm8, %v4217_v44, %v4253_v45  ;;  %v4309_v45 = vld [vmem:[#allocation4] sm:$0x3] }
 0x328   : > { %v4114_v39 = vpop.xlane.xlu0 %4113 }
 0x329   : > { %v4218_v46 = vperm.slane %v4114_v39, %v7301_v16 }
 0x32b   : > { %v4255_v52 = vsel %vm4244_vm9, %v4218_v46, %v4254_v50 }
 0x330   : > { %v4120_v47 = vpop.xlane.xlu2 %4119  ;;  %v4117_v49 = vpop.xlane.xlu0 %4116 }
 0x331   : > { %v4123_v48 = vpop.xlane.xlu1 %4122  ;;  %v4219_v51 = vperm.slane %v4117_v49, %v7301_v16  ;;  %v4220_v53 = vperm.slane %v4120_v47, %v7301_v16 }
 0x332   : > { %v4221_v54 = vperm.slane %v4123_v48, %v7301_v16 }
 0x333   : > { %v4256_v55 = vsel %vm4246_vm10, %v4219_v51, %v4255_v52 }
 0x334   : > { %v4257_v56 = vsel %vm4248_vm11, %v4220_v53, %v4256_v55 }
 0x335   : > { %v4258_v57 = vsel %vm4250_vm12, %v4221_v54, %v4257_v56 }
 0x336   : > { %4278 = vxpose.xlu2.b32.cont [2/4] (short) (narrow) %v4258_v57, 8 }
 0x339   : > { %v4126_v58 = vpop.xlane.xlu1 %4125  ;;  %v4129_v59 = vpop.xlane.xlu2 %4128 }
 0x33a   : > { %v4223_v63 = vperm.slane %v4129_v59, %v7301_v16  ;;  %v4222_v0 = vperm.slane %v4126_v58, %v7301_v16 }
 0x33c   : > { %v4259_v2 = vsel %vm4238_vm6, %v4223_v63, %v4222_v0 }
 0x341   : > { %v4135_v60 = vpop.xlane.xlu0 %4134  ;;  %v4132_v61 = vpop.xlane.xlu1 %4131 }
 0x342   : > { %v4224_v1 = vperm.slane %v4132_v61, %v7301_v16  ;;  %v4225_v3 = vperm.slane %v4135_v60, %v7301_v16 }
 0x344   : > { %v4260_v4 = vsel %vm4240_vm7, %v4224_v1, %v4259_v2 }
 0x345   : > { %v4261_v10 = vsel %vm4242_vm8, %v4225_v3, %v4260_v4 }
 0x348   : > { %v4138_v62 = vpop.xlane.xlu2 %4137 }
 0x349   : > { %v4226_v5 = vperm.slane %v4138_v62, %v7301_v16 }
 0x34b   : > { %v4262_v12 = vsel %vm4244_vm9, %v4226_v5, %v4261_v10 }
 0x350   : > { %v4144_v6 = vpop.xlane.xlu1 %4143  ;;  %v4141_v9 = vpop.xlane.xlu2 %4140 }
 0x351   : > { %v4147_v7 = vpop.xlane.xlu0 %4146  ;;  %v4227_v11 = vperm.slane %v4141_v9, %v7301_v16  ;;  %v4228_v13 = vperm.slane %v4144_v6, %v7301_v16 }
 0x352   : > { %v4229_v14 = vperm.slane %v4147_v7, %v7301_v16 }
 0x353   : > { %v4263_v15 = vsel %vm4246_vm10, %v4227_v11, %v4262_v12 }
 0x354   : > { %v4264_v17 = vsel %vm4248_vm11, %v4228_v13, %v4263_v15 }
 0x355   : > { %v4265_v18 = vsel %vm4250_vm12, %v4229_v14, %v4264_v17 }
 0x356   : > { %4279 = vxpose.xlu2.b32.cont [3/4] (short) (narrow) %v4265_v18, 8 }
 0x359   : > { %v4150_v19 = vpop.xlane.xlu0 %4149  ;;  %v4153_v20 = vpop.xlane.xlu1 %4152 }
 0x35a   : > { %v4231_v23 = vperm.slane %v4153_v20, %v7301_v16  ;;  %v4230_v25 = vperm.slane %v4150_v19, %v7301_v16 }
 0x35c   : > { %v4266_v28 = vsel %vm4238_vm6, %v4231_v23, %v4230_v25 }
 0x361   : > { %v4159_v21 = vpop.xlane.xlu2 %4158  ;;  %v4156_v22 = vpop.xlane.xlu0 %4155 }
 0x362   : > { %v4232_v26 = vperm.slane %v4156_v22, %v7301_v16  ;;  %v4233_v29 = vperm.slane %v4159_v21, %v7301_v16 }
 0x364   : > { %v4267_v30 = vsel %vm4240_vm7, %v4232_v26, %v4266_v28 }
 0x365   : > { %v4268_v33 = vsel %vm4242_vm8, %v4233_v29, %v4267_v30 }
 0x368   : > { %v4162_v27 = vpop.xlane.xlu1 %4161 }
 0x369   : > { %v4234_v31 = vperm.slane %v4162_v27, %v7301_v16  ;;  %v4165_v32 = vpop.xlane.xlu2 %4164 }
 0x36a   : > { %v4235_v34 = vperm.slane %v4165_v32, %v7301_v16 }
 0x36b   : > { %v4269_v35 = vsel %vm4244_vm9, %v4234_v31, %v4268_v33 }
 0x36c   : > { %v4270_v39 = vsel %vm4246_vm10, %v4235_v34, %v4269_v35 }
 0x370   : > { %v4168_v36 = vpop.xlane.xlu0 %4167 }
 0x371   : > { %v4236_v37 = vperm.slane %v4168_v36, %v7301_v16  ;;  %v4171_v38 = vpop.xlane.xlu1 %4170 }
 0x372   : > { %v4237_v40 = vperm.slane %v4171_v38, %v7301_v16 }
 0x373   : > { %v4271_v41 = vsel %vm4248_vm11, %v4236_v37, %v4270_v39 }
 0x374   : > { %v4272_v42 = vsel %vm4250_vm12, %v4237_v40, %v4271_v41 }
 0x375   : > { %4280 = vxpose.xlu2.b32.end [4/4] (short) (narrow) %v4272_v42, 8 }
 0x3f6   : > { %v4293_v43 = vpop.trf.xlu2 }
 0x3f7   : > { %v4310_v44 = vpack.c.bf16 %v4293_v43, %v4293_v43 }
 0x3f9   : > { %5856 = vmatmul.msk.bf16.vlgmr.msra.gmra.mxu0 %vm4327_vm13, %v4310_v44 }
 0x476   : > { %v4340_v46 = vpop.f32.mrf.mxu0 }
 0x477   : > { %v4344_v47 = vadd.f32 %v4340_v46, %v4309_v45 }
 0x479   : > { %4345 = vst.msk [vmem:[#allocation4] sm:$0x3] %vm4075_vm5, %v4344_v47 }
 0x47a   : > { %4349 = sbr.rel (%p5857_p6) target bundleno = 1301 (0x515), region = 88 }
 0x47e   : > { %v4342_v48 = vpop.f32.mrf.mxu0 }
 0x47f   : > { %v6218_v16 = vld [vmem:[%s7406_s13 + $0x18] sm:$0xff]  ;;  %v6217_v49 = vld [vmem:[%s7406_s13 + $0x10] sm:$0xff]  ;;  %v6240_v51 = vld [vmem:[%s7405_s12] ss:$0 sm:$0xff]  ;;  %vm4410_vm14 = vcmask 25600  }
 0x480   : > { %4401 = vmatpush.bf16.msra.mxu0 %v6218_v16  ;;  %v4350_v50 = vld [vmem:[#allocation4] sm:$0x3]  ;;  %v6215_v55 = vld [vmem:[%s7406_s13] sm:$0xff] }
 0x481   : > { %v4355_v52 = vadd.f32 %v6240_v51, %v4350_v50  ;;  %v6216_v53 = vld [vmem:[%s7406_s13 + $0x8] sm:$0xff]  ;;  %v6241_v57 = vld [vmem:[%s7407_s14] ss:$0 sm:$0xff] }
 0x483   : > { %v4356_v54 = vmax.f32 %v4355_v52, 0.0 }
 0x484   : > { %4402 = vmatpush.bf16.msra.mxu0 %v6217_v49 }
 0x485   : > { %v4357_v56 = vpack.c.bf16 %v4356_v54, %v4356_v54 }
 0x488   : > { %4403 = vmatpush.bf16.msra.mxu0 %v6216_v53 }
 0x48c   : > { %4404 = vmatpush.bf16.msra.mxu0 %v6215_v55 }
 0x48f   : > { %5874 = vmatmul.msk.bf16.vlgmr.msra.gmra.mxu0 %vm2878_vm4, %v4357_v56 }
 0x50c   : > { %v4406_v58 = vpop.f32.mrf.mxu0 }
 0x50d   : > { %v4407_v59 = vadd.f32 %v6241_v57, %v4406_v58 }
 0x50f   : > { %4411 = vst.msk [vmem:[#allocation5] sm:$0x3] %vm4410_vm14, %v4407_v59 }
 0x514   : > { %v4408_v60 = vpop.f32.mrf.mxu0 }
 0x515 PF: > { %p6223_p7 = scmp.eq.s32.totalorder %s6370_s19, 1  ;;  %s6283_s27 = smov [#allocation5]  }
 0x516   : > { %s4418_s25 = sshll.u32 %s6283_s27, 4  ;;  %s4420_s30 = sshll.u32 %s7408_s15, 4  ;;  %s4419_s25 = int_to_ptr.vmem [resolvable:$true] %s4418_s25  ;;  %s4421_s30 = int_to_ptr.hbm [resolvable:$true] %s4420_s30 }
 0x517   : > { %6220 = dma.vmem_to_hbm [thread:$0]  (%p6223_p7), %s4419_s25, 32, %s4421_s30, [#allocation6]  }
 0x518   : > { %6275 = dma.done.wait (%p6223_p7), [#allocation6], 32  }
 0x519   : > { %6277 = vsyncadd (%p6223_p7), [#allocation6], 4294967264 }
 0x51a PF: > { %s26_s18 = sadd.s32 1, %s6280_s18  }
 0x51b   : > { %p23_p8 = scmp.ge.s32.totalorder %s26_s18, 4  }
 0x51d   :  { %25 = sbr.rel (!%p23_p8) target bundleno = 1 (0x1), region = 118 }
 0x522   :  { %4434 = vsyncpa [#allocation6], 1 }
 0x523   :  { %4436 = vsyncpa [#allocation6 + $0x1], 1 }

</bundles_post_ra>
